<compile_context>
chip_gen: v7x
topology: tpu7x:2x2x1
jax: 0.10.0
libtpu: 0.0.40
codegen_flags: <defaults>
</compile_context>

<pallas_src>
import jax
import jax.numpy as jnp
import numpy as np
from jax.experimental import pallas as pl
from jax.experimental.pallas import tpu as pltpu


def _round_up(x, m):
    return ((x + m - 1) // m) * m


def _encoder_kernel_factory(vocab_size, wordvec_size, hidden_size, batch,
                            batch_pad, seq_len):
    V, W, H, B, Bp, T = vocab_size, wordvec_size, hidden_size, batch, batch_pad, seq_len

    def kernel(ids_ref, table_ref, wih_ref, whh_ref, bias_ref, hn_ref,
               emb_ref, xproj_ref, gather_sem):
        # ---------- Embedding gather: per-token row DMA from the HBM table ----------
        # The table never enters VMEM wholesale; only the T*B used rows are copied.
        # Rows for padded batch slots b in [B, Bp) are never written: they hold
        # arbitrary data, but every downstream op (row-wise matmul, per-row gate math)
        # is independent across rows, so real rows are unaffected; the wrapper
        # discards the padded rows of hn.
        copies = []
        for i in range(T * B):                        # static trip count (unrolled)
            tok = ids_ref[i]                          # dynamic token id from SMEM
            t, b = divmod(i, B)
            dst = t * Bp + b                          # static destination row
            cp = pltpu.make_async_copy(
                table_ref.at[pl.ds(tok, 1), :],       # (1, W) row in HBM
                emb_ref.at[pl.ds(dst, 1), :],         # (1, W) row in VMEM
                gather_sem.at[i])
            cp.start()
            copies.append(cp)
        for cp in copies:                             # all gathers in flight; drain
            cp.wait()

        # ---------- Hoisted input projection for all T (one MXU matmul) -------------
        # bf16 operands / f32 accumulation; bias added once for all timesteps.
        # NOTE: at production T this scratch should be chunked over time
        # (pltpu.emit_pipeline double-buffering, bf16 storage); at T=8 it is ~32 KiB.
        xproj = jnp.dot(emb_ref[...].astype(jnp.bfloat16), wih_ref[...],
                        preferred_element_type=jnp.float32)       # (T*Bp, 4H)
        xproj_ref[...] = xproj + bias_ref[...]

        # ---------- Serial recurrence: only h @ W_hh^T + pointwise gates ------------
        def step(t, carry):
            h, c = carry                                          # (Bp, H) f32
            row0 = pl.multiple_of(t * Bp, 8)                      # sublane-aligned slab
            x_t = xproj_ref[pl.ds(row0, Bp), :]                   # (Bp, 4H) f32
            # W_hh stays VMEM-resident: read inside the loop, not hoisted to vregs.
            gates = x_t + jnp.dot(h.astype(jnp.bfloat16), whh_ref[...],
                                  preferred_element_type=jnp.float32)  # (Bp, 4H)
            # PyTorch gate order i, f, g, o; packed 4H lanes, no per-gate padding.
            i_g = jax.nn.sigmoid(gates[:, 0 * H:1 * H])
            f_g = jax.nn.sigmoid(gates[:, 1 * H:2 * H])
            g_g = jnp.tanh(gates[:, 2 * H:3 * H])
            o_g = jax.nn.sigmoid(gates[:, 3 * H:4 * H])
            c_new = f_g * c + i_g * g_g
            h_new = o_g * jnp.tanh(c_new)
            return (h_new, c_new)

        h0 = jnp.zeros((Bp, H), jnp.float32)
        c0 = jnp.zeros((Bp, H), jnp.float32)
        h_fin, _c_fin = jax.lax.fori_loop(0, T, step, (h0, c0), unroll=True)
        hn_ref[...] = h_fin                         # (Bp, H); batch rows sliced in wrapper

    return kernel


def encoder_forward(xs, emb_table, w_ih, w_hh, b_ih, b_hh):
    """xs: (BATCH, SEQ) int32 token ids. Returns hn: (1, BATCH, HIDDEN) float32."""
    B, T = xs.shape
    V, W = emb_table.shape
    H = w_hh.shape[1]
    Bp = _round_up(B, 8)        # sublane-aligned per-timestep slab height

    # Glue: layout / parameter prep only.
    ids = jnp.transpose(xs, (1, 0)).reshape(T * B).astype(jnp.int32)   # time-major flat
    wih_t = jnp.transpose(w_ih, (1, 0)).astype(jnp.bfloat16)           # (W, 4H) MXU rhs
    whh_t = jnp.transpose(w_hh, (1, 0)).astype(jnp.bfloat16)           # (H, 4H) MXU rhs
    bias = (b_ih + b_hh).reshape(1, 4 * H).astype(jnp.float32)

    kernel = _encoder_kernel_factory(V, W, H, B, Bp, T)
    vmem = pl.BlockSpec(memory_space=pltpu.MemorySpace.VMEM)
    hn_pad = pl.pallas_call(
        kernel,
        out_shape=jax.ShapeDtypeStruct((Bp, H), jnp.float32),
        in_specs=[
            pl.BlockSpec(memory_space=pltpu.MemorySpace.SMEM),   # token ids (scalars)
            pl.BlockSpec(memory_space=pl.ANY),                   # embedding table, HBM
            vmem, vmem, vmem,                                    # W_ih^T, W_hh^T, bias
        ],
        out_specs=vmem,
        scratch_shapes=[
            pltpu.VMEM((T * Bp, W), jnp.float32),       # gathered embeddings
            pltpu.VMEM((T * Bp, 4 * H), jnp.float32),   # hoisted x-projection
            pltpu.SemaphoreType.DMA((T * B,)),          # one slot per gather row
        ],
        # No vmem_limit_bytes over-ask: total footprint is ~100 KiB, well inside the
        # default scoped VMEM budget on v5e/v6e/v7x.
    )(ids, emb_table.astype(jnp.float32), wih_t, whh_t, bias)

    # Padded batch rows are discarded; num_layers = 1.
    return hn_pad[:B].reshape(1, B, H)


def _reference_forward(xs, emb_table, w_ih, w_hh, b_ih, b_hh):
    """Pure-JAX f32 reference matching torch.nn.Embedding + torch.nn.LSTM(batch_first)."""
    B, T = xs.shape
    H = w_hh.shape[1]
    emb = emb_table[xs]                      # (B, T, W)
    bias = b_ih + b_hh

    def step(carry, x_t):
        h, c = carry
        gates = x_t @ w_ih.T + h @ w_hh.T + bias
        i_g = jax.nn.sigmoid(gates[:, 0 * H:1 * H])
        f_g = jax.nn.sigmoid(gates[:, 1 * H:2 * H])
        g_g = jnp.tanh(gates[:, 2 * H:3 * H])
        o_g = jax.nn.sigmoid(gates[:, 3 * H:4 * H])
        c_new = f_g * c + i_g * g_g
        h_new = o_g * jnp.tanh(c_new)
        return (h_new, c_new), None

    h0 = jnp.zeros((B, H), jnp.float32)
    c0 = jnp.zeros((B, H), jnp.float32)
    (h_fin, _), _ = jax.lax.scan(step, (h0, c0), jnp.transpose(emb, (1, 0, 2)))
    return h_fin.reshape(1, B, H)


if __name__ == "__main__":
    # Small shapes consistent with the module's forward.
    VOCAB = 50
    WORDVEC = 16
    HIDDEN = 32
    BATCH = 2
    SEQ = 8

    key = jax.random.PRNGKey(0)
    k_emb, k_wih, k_whh, k_bih, k_bhh, k_xs = jax.random.split(key, 6)

    # Deterministic parameter init (shapes follow nn.Embedding / nn.LSTM).
    a_emb = float(np.sqrt(6.0 / (VOCAB + WORDVEC)))             # xavier_uniform_
    emb_table = jax.random.uniform(k_emb, (VOCAB, WORDVEC), jnp.float32, -a_emb, a_emb)
    a_lstm = 1.0 / float(np.sqrt(HIDDEN))                       # torch LSTM default
    w_ih = jax.random.uniform(k_wih, (4 * HIDDEN, WORDVEC), jnp.float32, -a_lstm, a_lstm)
    w_hh = jax.random.uniform(k_whh, (4 * HIDDEN, HIDDEN), jnp.float32, -a_lstm, a_lstm)
    b_ih = jax.random.uniform(k_bih, (4 * HIDDEN,), jnp.float32, -a_lstm, a_lstm)
    b_hh = jax.random.uniform(k_bhh, (4 * HIDDEN,), jnp.float32, -a_lstm, a_lstm)

    xs = jax.random.randint(k_xs, (BATCH, SEQ), 0, VOCAB, dtype=jnp.int32)

    hn = encoder_forward(xs, emb_table, w_ih, w_hh, b_ih, b_hh)
    hn = jax.block_until_ready(hn)

    hn_ref = _reference_forward(xs, emb_table, w_ih, w_hh, b_ih, b_hh)
    # Embeddings are gathered exactly in f32; only MXU operands (W_ih, W_hh, h) are
    # bf16 with f32 accumulation, so compare against the f32 reference with a
    # correspondingly loose tolerance.
    np.testing.assert_allclose(np.asarray(hn), np.asarray(hn_ref), rtol=2e-2, atol=2e-2)
    assert hn.shape == (1, BATCH, HIDDEN)

    print("KERNEL_OK")
</pallas_src>

<mosaic_0001>
module attributes {stable_mosaic.version = 11 : i64} {
  func.func @kernel(%arg0: memref<16xi32, #tpu.memory_space<smem>>, %arg1: memref<50x16xf32, #tpu.memory_space<any>>, %arg2: memref<16x128xbf16, #tpu.memory_space<vmem>>, %arg3: memref<32x128xbf16, #tpu.memory_space<vmem>>, %arg4: memref<1x128xf32, #tpu.memory_space<vmem>>, %arg5: memref<8x32xf32, #tpu.memory_space<vmem>>, %arg6: memref<64x16xf32, #tpu.memory_space<vmem>>, %arg7: memref<64x128xf32, #tpu.memory_space<vmem>>, %arg8: memref<16x!tpu.dma_semaphore, #tpu.memory_space<semaphore_mem>>) attributes {dimension_semantics = [], scalar_prefetch = 0 : i64, scratch_operands = 3 : i64, tpu.core_type = #tpu.core_type<tc>} {
    %c0 = arith.constant 0 : index
    %0 = memref.load %arg0[%c0] : memref<16xi32, #tpu.memory_space<smem>>
    %c0_i32 = arith.constant 0 : i32
    %c0_i32_0 = arith.constant 0 : i32
    %1 = tpu.memref_slice %arg1[%0, %c0_i32_0] : memref<50x16xf32, #tpu.memory_space<any>> -> memref<1x16xf32, #tpu.memory_space<any>>
    %c0_i32_1 = arith.constant 0 : i32
    %c0_i32_2 = arith.constant 0 : i32
    %2 = tpu.memref_slice %arg6[%c0_i32_1, %c0_i32_2] : memref<64x16xf32, #tpu.memory_space<vmem>> -> memref<1x16xf32, #tpu.memory_space<vmem>>
    %3 = tpu.memref_slice %arg8[%c0_i32] : memref<16x!tpu.dma_semaphore, #tpu.memory_space<semaphore_mem>> -> memref<1x!tpu.dma_semaphore, #tpu.memory_space<semaphore_mem>>
    %4 = tpu.memref_squeeze %3 : memref<1x!tpu.dma_semaphore, #tpu.memory_space<semaphore_mem>> -> memref<!tpu.dma_semaphore, #tpu.memory_space<semaphore_mem>>
    tpu.enqueue_dma source(%1 : memref<1x16xf32, #tpu.memory_space<any>>) target(%2 : memref<1x16xf32, #tpu.memory_space<vmem>>) target_semaphore(%4 : memref<!tpu.dma_semaphore, #tpu.memory_space<semaphore_mem>>)
    %c1 = arith.constant 1 : index
    %5 = memref.load %arg0[%c1] : memref<16xi32, #tpu.memory_space<smem>>
    %c1_i32 = arith.constant 1 : i32
    %c0_i32_3 = arith.constant 0 : i32
    %6 = tpu.memref_slice %arg1[%5, %c0_i32_3] : memref<50x16xf32, #tpu.memory_space<any>> -> memref<1x16xf32, #tpu.memory_space<any>>
    %c1_i32_4 = arith.constant 1 : i32
    %c0_i32_5 = arith.constant 0 : i32
    %7 = tpu.memref_slice %arg6[%c1_i32_4, %c0_i32_5] : memref<64x16xf32, #tpu.memory_space<vmem>> -> memref<1x16xf32, #tpu.memory_space<vmem>>
    %8 = tpu.memref_slice %arg8[%c1_i32] : memref<16x!tpu.dma_semaphore, #tpu.memory_space<semaphore_mem>> -> memref<1x!tpu.dma_semaphore, #tpu.memory_space<semaphore_mem>>
    %9 = tpu.memref_squeeze %8 : memref<1x!tpu.dma_semaphore, #tpu.memory_space<semaphore_mem>> -> memref<!tpu.dma_semaphore, #tpu.memory_space<semaphore_mem>>
    tpu.enqueue_dma source(%6 : memref<1x16xf32, #tpu.memory_space<any>>) target(%7 : memref<1x16xf32, #tpu.memory_space<vmem>>) target_semaphore(%9 : memref<!tpu.dma_semaphore, #tpu.memory_space<semaphore_mem>>)
    %c2 = arith.constant 2 : index
    %10 = memref.load %arg0[%c2] : memref<16xi32, #tpu.memory_space<smem>>
    %c2_i32 = arith.constant 2 : i32
    %c0_i32_6 = arith.constant 0 : i32
    %11 = tpu.memref_slice %arg1[%10, %c0_i32_6] : memref<50x16xf32, #tpu.memory_space<any>> -> memref<1x16xf32, #tpu.memory_space<any>>
    %c8_i32 = arith.constant 8 : i32
    %c0_i32_7 = arith.constant 0 : i32
    %12 = tpu.memref_slice %arg6[%c8_i32, %c0_i32_7] : memref<64x16xf32, #tpu.memory_space<vmem>> -> memref<1x16xf32, #tpu.memory_space<vmem>>
    %13 = tpu.memref_slice %arg8[%c2_i32] : memref<16x!tpu.dma_semaphore, #tpu.memory_space<semaphore_mem>> -> memref<1x!tpu.dma_semaphore, #tpu.memory_space<semaphore_mem>>
    %14 = tpu.memref_squeeze %13 : memref<1x!tpu.dma_semaphore, #tpu.memory_space<semaphore_mem>> -> memref<!tpu.dma_semaphore, #tpu.memory_space<semaphore_mem>>
    tpu.enqueue_dma source(%11 : memref<1x16xf32, #tpu.memory_space<any>>) target(%12 : memref<1x16xf32, #tpu.memory_space<vmem>>) target_semaphore(%14 : memref<!tpu.dma_semaphore, #tpu.memory_space<semaphore_mem>>)
    %c3 = arith.constant 3 : index
    %15 = memref.load %arg0[%c3] : memref<16xi32, #tpu.memory_space<smem>>
    %c3_i32 = arith.constant 3 : i32
    %c0_i32_8 = arith.constant 0 : i32
    %16 = tpu.memref_slice %arg1[%15, %c0_i32_8] : memref<50x16xf32, #tpu.memory_space<any>> -> memref<1x16xf32, #tpu.memory_space<any>>
    %c9_i32 = arith.constant 9 : i32
    %c0_i32_9 = arith.constant 0 : i32
    %17 = tpu.memref_slice %arg6[%c9_i32, %c0_i32_9] : memref<64x16xf32, #tpu.memory_space<vmem>> -> memref<1x16xf32, #tpu.memory_space<vmem>>
    %18 = tpu.memref_slice %arg8[%c3_i32] : memref<16x!tpu.dma_semaphore, #tpu.memory_space<semaphore_mem>> -> memref<1x!tpu.dma_semaphore, #tpu.memory_space<semaphore_mem>>
    %19 = tpu.memref_squeeze %18 : memref<1x!tpu.dma_semaphore, #tpu.memory_space<semaphore_mem>> -> memref<!tpu.dma_semaphore, #tpu.memory_space<semaphore_mem>>
    tpu.enqueue_dma source(%16 : memref<1x16xf32, #tpu.memory_space<any>>) target(%17 : memref<1x16xf32, #tpu.memory_space<vmem>>) target_semaphore(%19 : memref<!tpu.dma_semaphore, #tpu.memory_space<semaphore_mem>>)
    %c4 = arith.constant 4 : index
    %20 = memref.load %arg0[%c4] : memref<16xi32, #tpu.memory_space<smem>>
    %c4_i32 = arith.constant 4 : i32
    %c0_i32_10 = arith.constant 0 : i32
    %21 = tpu.memref_slice %arg1[%20, %c0_i32_10] : memref<50x16xf32, #tpu.memory_space<any>> -> memref<1x16xf32, #tpu.memory_space<any>>
    %c16_i32 = arith.constant 16 : i32
    %c0_i32_11 = arith.constant 0 : i32
    %22 = tpu.memref_slice %arg6[%c16_i32, %c0_i32_11] : memref<64x16xf32, #tpu.memory_space<vmem>> -> memref<1x16xf32, #tpu.memory_space<vmem>>
    %23 = tpu.memref_slice %arg8[%c4_i32] : memref<16x!tpu.dma_semaphore, #tpu.memory_space<semaphore_mem>> -> memref<1x!tpu.dma_semaphore, #tpu.memory_space<semaphore_mem>>
    %24 = tpu.memref_squeeze %23 : memref<1x!tpu.dma_semaphore, #tpu.memory_space<semaphore_mem>> -> memref<!tpu.dma_semaphore, #tpu.memory_space<semaphore_mem>>
    tpu.enqueue_dma source(%21 : memref<1x16xf32, #tpu.memory_space<any>>) target(%22 : memref<1x16xf32, #tpu.memory_space<vmem>>) target_semaphore(%24 : memref<!tpu.dma_semaphore, #tpu.memory_space<semaphore_mem>>)
    %c5 = arith.constant 5 : index
    %25 = memref.load %arg0[%c5] : memref<16xi32, #tpu.memory_space<smem>>
    %c5_i32 = arith.constant 5 : i32
    %c0_i32_12 = arith.constant 0 : i32
    %26 = tpu.memref_slice %arg1[%25, %c0_i32_12] : memref<50x16xf32, #tpu.memory_space<any>> -> memref<1x16xf32, #tpu.memory_space<any>>
    %c17_i32 = arith.constant 17 : i32
    %c0_i32_13 = arith.constant 0 : i32
    %27 = tpu.memref_slice %arg6[%c17_i32, %c0_i32_13] : memref<64x16xf32, #tpu.memory_space<vmem>> -> memref<1x16xf32, #tpu.memory_space<vmem>>
    %28 = tpu.memref_slice %arg8[%c5_i32] : memref<16x!tpu.dma_semaphore, #tpu.memory_space<semaphore_mem>> -> memref<1x!tpu.dma_semaphore, #tpu.memory_space<semaphore_mem>>
    %29 = tpu.memref_squeeze %28 : memref<1x!tpu.dma_semaphore, #tpu.memory_space<semaphore_mem>> -> memref<!tpu.dma_semaphore, #tpu.memory_space<semaphore_mem>>
    tpu.enqueue_dma source(%26 : memref<1x16xf32, #tpu.memory_space<any>>) target(%27 : memref<1x16xf32, #tpu.memory_space<vmem>>) target_semaphore(%29 : memref<!tpu.dma_semaphore, #tpu.memory_space<semaphore_mem>>)
    %c6 = arith.constant 6 : index
    %30 = memref.load %arg0[%c6] : memref<16xi32, #tpu.memory_space<smem>>
    %c6_i32 = arith.constant 6 : i32
    %c0_i32_14 = arith.constant 0 : i32
    %31 = tpu.memref_slice %arg1[%30, %c0_i32_14] : memref<50x16xf32, #tpu.memory_space<any>> -> memref<1x16xf32, #tpu.memory_space<any>>
    %c24_i32 = arith.constant 24 : i32
    %c0_i32_15 = arith.constant 0 : i32
    %32 = tpu.memref_slice %arg6[%c24_i32, %c0_i32_15] : memref<64x16xf32, #tpu.memory_space<vmem>> -> memref<1x16xf32, #tpu.memory_space<vmem>>
    %33 = tpu.memref_slice %arg8[%c6_i32] : memref<16x!tpu.dma_semaphore, #tpu.memory_space<semaphore_mem>> -> memref<1x!tpu.dma_semaphore, #tpu.memory_space<semaphore_mem>>
    %34 = tpu.memref_squeeze %33 : memref<1x!tpu.dma_semaphore, #tpu.memory_space<semaphore_mem>> -> memref<!tpu.dma_semaphore, #tpu.memory_space<semaphore_mem>>
    tpu.enqueue_dma source(%31 : memref<1x16xf32, #tpu.memory_space<any>>) target(%32 : memref<1x16xf32, #tpu.memory_space<vmem>>) target_semaphore(%34 : memref<!tpu.dma_semaphore, #tpu.memory_space<semaphore_mem>>)
    %c7 = arith.constant 7 : index
    %35 = memref.load %arg0[%c7] : memref<16xi32, #tpu.memory_space<smem>>
    %c7_i32 = arith.constant 7 : i32
    %c0_i32_16 = arith.constant 0 : i32
    %36 = tpu.memref_slice %arg1[%35, %c0_i32_16] : memref<50x16xf32, #tpu.memory_space<any>> -> memref<1x16xf32, #tpu.memory_space<any>>
    %c25_i32 = arith.constant 25 : i32
    %c0_i32_17 = arith.constant 0 : i32
    %37 = tpu.memref_slice %arg6[%c25_i32, %c0_i32_17] : memref<64x16xf32, #tpu.memory_space<vmem>> -> memref<1x16xf32, #tpu.memory_space<vmem>>
    %38 = tpu.memref_slice %arg8[%c7_i32] : memref<16x!tpu.dma_semaphore, #tpu.memory_space<semaphore_mem>> -> memref<1x!tpu.dma_semaphore, #tpu.memory_space<semaphore_mem>>
    %39 = tpu.memref_squeeze %38 : memref<1x!tpu.dma_semaphore, #tpu.memory_space<semaphore_mem>> -> memref<!tpu.dma_semaphore, #tpu.memory_space<semaphore_mem>>
    tpu.enqueue_dma source(%36 : memref<1x16xf32, #tpu.memory_space<any>>) target(%37 : memref<1x16xf32, #tpu.memory_space<vmem>>) target_semaphore(%39 : memref<!tpu.dma_semaphore, #tpu.memory_space<semaphore_mem>>)
    %c8 = arith.constant 8 : index
    %40 = memref.load %arg0[%c8] : memref<16xi32, #tpu.memory_space<smem>>
    %c8_i32_18 = arith.constant 8 : i32
    %c0_i32_19 = arith.constant 0 : i32
    %41 = tpu.memref_slice %arg1[%40, %c0_i32_19] : memref<50x16xf32, #tpu.memory_space<any>> -> memref<1x16xf32, #tpu.memory_space<any>>
    %c32_i32 = arith.constant 32 : i32
    %c0_i32_20 = arith.constant 0 : i32
    %42 = tpu.memref_slice %arg6[%c32_i32, %c0_i32_20] : memref<64x16xf32, #tpu.memory_space<vmem>> -> memref<1x16xf32, #tpu.memory_space<vmem>>
    %43 = tpu.memref_slice %arg8[%c8_i32_18] : memref<16x!tpu.dma_semaphore, #tpu.memory_space<semaphore_mem>> -> memref<1x!tpu.dma_semaphore, #tpu.memory_space<semaphore_mem>>
    %44 = tpu.memref_squeeze %43 : memref<1x!tpu.dma_semaphore, #tpu.memory_space<semaphore_mem>> -> memref<!tpu.dma_semaphore, #tpu.memory_space<semaphore_mem>>
    tpu.enqueue_dma source(%41 : memref<1x16xf32, #tpu.memory_space<any>>) target(%42 : memref<1x16xf32, #tpu.memory_space<vmem>>) target_semaphore(%44 : memref<!tpu.dma_semaphore, #tpu.memory_space<semaphore_mem>>)
    %c9 = arith.constant 9 : index
    %45 = memref.load %arg0[%c9] : memref<16xi32, #tpu.memory_space<smem>>
    %c9_i32_21 = arith.constant 9 : i32
    %c0_i32_22 = arith.constant 0 : i32
    %46 = tpu.memref_slice %arg1[%45, %c0_i32_22] : memref<50x16xf32, #tpu.memory_space<any>> -> memref<1x16xf32, #tpu.memory_space<any>>
    %c33_i32 = arith.constant 33 : i32
    %c0_i32_23 = arith.constant 0 : i32
    %47 = tpu.memref_slice %arg6[%c33_i32, %c0_i32_23] : memref<64x16xf32, #tpu.memory_space<vmem>> -> memref<1x16xf32, #tpu.memory_space<vmem>>
    %48 = tpu.memref_slice %arg8[%c9_i32_21] : memref<16x!tpu.dma_semaphore, #tpu.memory_space<semaphore_mem>> -> memref<1x!tpu.dma_semaphore, #tpu.memory_space<semaphore_mem>>
    %49 = tpu.memref_squeeze %48 : memref<1x!tpu.dma_semaphore, #tpu.memory_space<semaphore_mem>> -> memref<!tpu.dma_semaphore, #tpu.memory_space<semaphore_mem>>
    tpu.enqueue_dma source(%46 : memref<1x16xf32, #tpu.memory_space<any>>) target(%47 : memref<1x16xf32, #tpu.memory_space<vmem>>) target_semaphore(%49 : memref<!tpu.dma_semaphore, #tpu.memory_space<semaphore_mem>>)
    %c10 = arith.constant 10 : index
    %50 = memref.load %arg0[%c10] : memref<16xi32, #tpu.memory_space<smem>>
    %c10_i32 = arith.constant 10 : i32
    %c0_i32_24 = arith.constant 0 : i32
    %51 = tpu.memref_slice %arg1[%50, %c0_i32_24] : memref<50x16xf32, #tpu.memory_space<any>> -> memref<1x16xf32, #tpu.memory_space<any>>
    %c40_i32 = arith.constant 40 : i32
    %c0_i32_25 = arith.constant 0 : i32
    %52 = tpu.memref_slice %arg6[%c40_i32, %c0_i32_25] : memref<64x16xf32, #tpu.memory_space<vmem>> -> memref<1x16xf32, #tpu.memory_space<vmem>>
    %53 = tpu.memref_slice %arg8[%c10_i32] : memref<16x!tpu.dma_semaphore, #tpu.memory_space<semaphore_mem>> -> memref<1x!tpu.dma_semaphore, #tpu.memory_space<semaphore_mem>>
    %54 = tpu.memref_squeeze %53 : memref<1x!tpu.dma_semaphore, #tpu.memory_space<semaphore_mem>> -> memref<!tpu.dma_semaphore, #tpu.memory_space<semaphore_mem>>
    tpu.enqueue_dma source(%51 : memref<1x16xf32, #tpu.memory_space<any>>) target(%52 : memref<1x16xf32, #tpu.memory_space<vmem>>) target_semaphore(%54 : memref<!tpu.dma_semaphore, #tpu.memory_space<semaphore_mem>>)
    %c11 = arith.constant 11 : index
    %55 = memref.load %arg0[%c11] : memref<16xi32, #tpu.memory_space<smem>>
    %c11_i32 = arith.constant 11 : i32
    %c0_i32_26 = arith.constant 0 : i32
    %56 = tpu.memref_slice %arg1[%55, %c0_i32_26] : memref<50x16xf32, #tpu.memory_space<any>> -> memref<1x16xf32, #tpu.memory_space<any>>
    %c41_i32 = arith.constant 41 : i32
    %c0_i32_27 = arith.constant 0 : i32
    %57 = tpu.memref_slice %arg6[%c41_i32, %c0_i32_27] : memref<64x16xf32, #tpu.memory_space<vmem>> -> memref<1x16xf32, #tpu.memory_space<vmem>>
    %58 = tpu.memref_slice %arg8[%c11_i32] : memref<16x!tpu.dma_semaphore, #tpu.memory_space<semaphore_mem>> -> memref<1x!tpu.dma_semaphore, #tpu.memory_space<semaphore_mem>>
    %59 = tpu.memref_squeeze %58 : memref<1x!tpu.dma_semaphore, #tpu.memory_space<semaphore_mem>> -> memref<!tpu.dma_semaphore, #tpu.memory_space<semaphore_mem>>
    tpu.enqueue_dma source(%56 : memref<1x16xf32, #tpu.memory_space<any>>) target(%57 : memref<1x16xf32, #tpu.memory_space<vmem>>) target_semaphore(%59 : memref<!tpu.dma_semaphore, #tpu.memory_space<semaphore_mem>>)
    %c12 = arith.constant 12 : index
    %60 = memref.load %arg0[%c12] : memref<16xi32, #tpu.memory_space<smem>>
    %c12_i32 = arith.constant 12 : i32
    %c0_i32_28 = arith.constant 0 : i32
    %61 = tpu.memref_slice %arg1[%60, %c0_i32_28] : memref<50x16xf32, #tpu.memory_space<any>> -> memref<1x16xf32, #tpu.memory_space<any>>
    %c48_i32 = arith.constant 48 : i32
    %c0_i32_29 = arith.constant 0 : i32
    %62 = tpu.memref_slice %arg6[%c48_i32, %c0_i32_29] : memref<64x16xf32, #tpu.memory_space<vmem>> -> memref<1x16xf32, #tpu.memory_space<vmem>>
    %63 = tpu.memref_slice %arg8[%c12_i32] : memref<16x!tpu.dma_semaphore, #tpu.memory_space<semaphore_mem>> -> memref<1x!tpu.dma_semaphore, #tpu.memory_space<semaphore_mem>>
    %64 = tpu.memref_squeeze %63 : memref<1x!tpu.dma_semaphore, #tpu.memory_space<semaphore_mem>> -> memref<!tpu.dma_semaphore, #tpu.memory_space<semaphore_mem>>
    tpu.enqueue_dma source(%61 : memref<1x16xf32, #tpu.memory_space<any>>) target(%62 : memref<1x16xf32, #tpu.memory_space<vmem>>) target_semaphore(%64 : memref<!tpu.dma_semaphore, #tpu.memory_space<semaphore_mem>>)
    %c13 = arith.constant 13 : index
    %65 = memref.load %arg0[%c13] : memref<16xi32, #tpu.memory_space<smem>>
    %c13_i32 = arith.constant 13 : i32
    %c0_i32_30 = arith.constant 0 : i32
    %66 = tpu.memref_slice %arg1[%65, %c0_i32_30] : memref<50x16xf32, #tpu.memory_space<any>> -> memref<1x16xf32, #tpu.memory_space<any>>
    %c49_i32 = arith.constant 49 : i32
    %c0_i32_31 = arith.constant 0 : i32
    %67 = tpu.memref_slice %arg6[%c49_i32, %c0_i32_31] : memref<64x16xf32, #tpu.memory_space<vmem>> -> memref<1x16xf32, #tpu.memory_space<vmem>>
    %68 = tpu.memref_slice %arg8[%c13_i32] : memref<16x!tpu.dma_semaphore, #tpu.memory_space<semaphore_mem>> -> memref<1x!tpu.dma_semaphore, #tpu.memory_space<semaphore_mem>>
    %69 = tpu.memref_squeeze %68 : memref<1x!tpu.dma_semaphore, #tpu.memory_space<semaphore_mem>> -> memref<!tpu.dma_semaphore, #tpu.memory_space<semaphore_mem>>
    tpu.enqueue_dma source(%66 : memref<1x16xf32, #tpu.memory_space<any>>) target(%67 : memref<1x16xf32, #tpu.memory_space<vmem>>) target_semaphore(%69 : memref<!tpu.dma_semaphore, #tpu.memory_space<semaphore_mem>>)
    %c14 = arith.constant 14 : index
    %70 = memref.load %arg0[%c14] : memref<16xi32, #tpu.memory_space<smem>>
    %c14_i32 = arith.constant 14 : i32
    %c0_i32_32 = arith.constant 0 : i32
    %71 = tpu.memref_slice %arg1[%70, %c0_i32_32] : memref<50x16xf32, #tpu.memory_space<any>> -> memref<1x16xf32, #tpu.memory_space<any>>
    %c56_i32 = arith.constant 56 : i32
    %c0_i32_33 = arith.constant 0 : i32
    %72 = tpu.memref_slice %arg6[%c56_i32, %c0_i32_33] : memref<64x16xf32, #tpu.memory_space<vmem>> -> memref<1x16xf32, #tpu.memory_space<vmem>>
    %73 = tpu.memref_slice %arg8[%c14_i32] : memref<16x!tpu.dma_semaphore, #tpu.memory_space<semaphore_mem>> -> memref<1x!tpu.dma_semaphore, #tpu.memory_space<semaphore_mem>>
    %74 = tpu.memref_squeeze %73 : memref<1x!tpu.dma_semaphore, #tpu.memory_space<semaphore_mem>> -> memref<!tpu.dma_semaphore, #tpu.memory_space<semaphore_mem>>
    tpu.enqueue_dma source(%71 : memref<1x16xf32, #tpu.memory_space<any>>) target(%72 : memref<1x16xf32, #tpu.memory_space<vmem>>) target_semaphore(%74 : memref<!tpu.dma_semaphore, #tpu.memory_space<semaphore_mem>>)
    %c15 = arith.constant 15 : index
    %75 = memref.load %arg0[%c15] : memref<16xi32, #tpu.memory_space<smem>>
    %c15_i32 = arith.constant 15 : i32
    %c0_i32_34 = arith.constant 0 : i32
    %76 = tpu.memref_slice %arg1[%75, %c0_i32_34] : memref<50x16xf32, #tpu.memory_space<any>> -> memref<1x16xf32, #tpu.memory_space<any>>
    %c57_i32 = arith.constant 57 : i32
    %c0_i32_35 = arith.constant 0 : i32
    %77 = tpu.memref_slice %arg6[%c57_i32, %c0_i32_35] : memref<64x16xf32, #tpu.memory_space<vmem>> -> memref<1x16xf32, #tpu.memory_space<vmem>>
    %78 = tpu.memref_slice %arg8[%c15_i32] : memref<16x!tpu.dma_semaphore, #tpu.memory_space<semaphore_mem>> -> memref<1x!tpu.dma_semaphore, #tpu.memory_space<semaphore_mem>>
    %79 = tpu.memref_squeeze %78 : memref<1x!tpu.dma_semaphore, #tpu.memory_space<semaphore_mem>> -> memref<!tpu.dma_semaphore, #tpu.memory_space<semaphore_mem>>
    tpu.enqueue_dma source(%76 : memref<1x16xf32, #tpu.memory_space<any>>) target(%77 : memref<1x16xf32, #tpu.memory_space<vmem>>) target_semaphore(%79 : memref<!tpu.dma_semaphore, #tpu.memory_space<semaphore_mem>>)
    %c0_i32_36 = arith.constant 0 : i32
    %c0_i32_37 = arith.constant 0 : i32
    %80 = tpu.memref_slice %arg1[%0, %c0_i32_37] : memref<50x16xf32, #tpu.memory_space<any>> -> memref<1x16xf32, #tpu.memory_space<any>>
    %c0_i32_38 = arith.constant 0 : i32
    %c0_i32_39 = arith.constant 0 : i32
    %81 = tpu.memref_slice %arg6[%c0_i32_38, %c0_i32_39] : memref<64x16xf32, #tpu.memory_space<vmem>> -> memref<1x16xf32, #tpu.memory_space<vmem>>
    %82 = tpu.memref_slice %arg8[%c0_i32_36] : memref<16x!tpu.dma_semaphore, #tpu.memory_space<semaphore_mem>> -> memref<1x!tpu.dma_semaphore, #tpu.memory_space<semaphore_mem>>
    %83 = tpu.memref_squeeze %82 : memref<1x!tpu.dma_semaphore, #tpu.memory_space<semaphore_mem>> -> memref<!tpu.dma_semaphore, #tpu.memory_space<semaphore_mem>>
    tpu.wait_dma2 semaphore(%83 : memref<!tpu.dma_semaphore, #tpu.memory_space<semaphore_mem>>) src(%80 : memref<1x16xf32, #tpu.memory_space<any>>) dst(%81 : memref<1x16xf32, #tpu.memory_space<vmem>>)
    %c1_i32_40 = arith.constant 1 : i32
    %c0_i32_41 = arith.constant 0 : i32
    %84 = tpu.memref_slice %arg1[%5, %c0_i32_41] : memref<50x16xf32, #tpu.memory_space<any>> -> memref<1x16xf32, #tpu.memory_space<any>>
    %c1_i32_42 = arith.constant 1 : i32
    %c0_i32_43 = arith.constant 0 : i32
    %85 = tpu.memref_slice %arg6[%c1_i32_42, %c0_i32_43] : memref<64x16xf32, #tpu.memory_space<vmem>> -> memref<1x16xf32, #tpu.memory_space<vmem>>
    %86 = tpu.memref_slice %arg8[%c1_i32_40] : memref<16x!tpu.dma_semaphore, #tpu.memory_space<semaphore_mem>> -> memref<1x!tpu.dma_semaphore, #tpu.memory_space<semaphore_mem>>
    %87 = tpu.memref_squeeze %86 : memref<1x!tpu.dma_semaphore, #tpu.memory_space<semaphore_mem>> -> memref<!tpu.dma_semaphore, #tpu.memory_space<semaphore_mem>>
    tpu.wait_dma2 semaphore(%87 : memref<!tpu.dma_semaphore, #tpu.memory_space<semaphore_mem>>) src(%84 : memref<1x16xf32, #tpu.memory_space<any>>) dst(%85 : memref<1x16xf32, #tpu.memory_space<vmem>>)
    %c2_i32_44 = arith.constant 2 : i32
    %c0_i32_45 = arith.constant 0 : i32
    %88 = tpu.memref_slice %arg1[%10, %c0_i32_45] : memref<50x16xf32, #tpu.memory_space<any>> -> memref<1x16xf32, #tpu.memory_space<any>>
    %c8_i32_46 = arith.constant 8 : i32
    %c0_i32_47 = arith.constant 0 : i32
    %89 = tpu.memref_slice %arg6[%c8_i32_46, %c0_i32_47] : memref<64x16xf32, #tpu.memory_space<vmem>> -> memref<1x16xf32, #tpu.memory_space<vmem>>
    %90 = tpu.memref_slice %arg8[%c2_i32_44] : memref<16x!tpu.dma_semaphore, #tpu.memory_space<semaphore_mem>> -> memref<1x!tpu.dma_semaphore, #tpu.memory_space<semaphore_mem>>
    %91 = tpu.memref_squeeze %90 : memref<1x!tpu.dma_semaphore, #tpu.memory_space<semaphore_mem>> -> memref<!tpu.dma_semaphore, #tpu.memory_space<semaphore_mem>>
    tpu.wait_dma2 semaphore(%91 : memref<!tpu.dma_semaphore, #tpu.memory_space<semaphore_mem>>) src(%88 : memref<1x16xf32, #tpu.memory_space<any>>) dst(%89 : memref<1x16xf32, #tpu.memory_space<vmem>>)
    %c3_i32_48 = arith.constant 3 : i32
    %c0_i32_49 = arith.constant 0 : i32
    %92 = tpu.memref_slice %arg1[%15, %c0_i32_49] : memref<50x16xf32, #tpu.memory_space<any>> -> memref<1x16xf32, #tpu.memory_space<any>>
    %c9_i32_50 = arith.constant 9 : i32
    %c0_i32_51 = arith.constant 0 : i32
    %93 = tpu.memref_slice %arg6[%c9_i32_50, %c0_i32_51] : memref<64x16xf32, #tpu.memory_space<vmem>> -> memref<1x16xf32, #tpu.memory_space<vmem>>
    %94 = tpu.memref_slice %arg8[%c3_i32_48] : memref<16x!tpu.dma_semaphore, #tpu.memory_space<semaphore_mem>> -> memref<1x!tpu.dma_semaphore, #tpu.memory_space<semaphore_mem>>
    %95 = tpu.memref_squeeze %94 : memref<1x!tpu.dma_semaphore, #tpu.memory_space<semaphore_mem>> -> memref<!tpu.dma_semaphore, #tpu.memory_space<semaphore_mem>>
    tpu.wait_dma2 semaphore(%95 : memref<!tpu.dma_semaphore, #tpu.memory_space<semaphore_mem>>) src(%92 : memref<1x16xf32, #tpu.memory_space<any>>) dst(%93 : memref<1x16xf32, #tpu.memory_space<vmem>>)
    %c4_i32_52 = arith.constant 4 : i32
    %c0_i32_53 = arith.constant 0 : i32
    %96 = tpu.memref_slice %arg1[%20, %c0_i32_53] : memref<50x16xf32, #tpu.memory_space<any>> -> memref<1x16xf32, #tpu.memory_space<any>>
    %c16_i32_54 = arith.constant 16 : i32
    %c0_i32_55 = arith.constant 0 : i32
    %97 = tpu.memref_slice %arg6[%c16_i32_54, %c0_i32_55] : memref<64x16xf32, #tpu.memory_space<vmem>> -> memref<1x16xf32, #tpu.memory_space<vmem>>
    %98 = tpu.memref_slice %arg8[%c4_i32_52] : memref<16x!tpu.dma_semaphore, #tpu.memory_space<semaphore_mem>> -> memref<1x!tpu.dma_semaphore, #tpu.memory_space<semaphore_mem>>
    %99 = tpu.memref_squeeze %98 : memref<1x!tpu.dma_semaphore, #tpu.memory_space<semaphore_mem>> -> memref<!tpu.dma_semaphore, #tpu.memory_space<semaphore_mem>>
    tpu.wait_dma2 semaphore(%99 : memref<!tpu.dma_semaphore, #tpu.memory_space<semaphore_mem>>) src(%96 : memref<1x16xf32, #tpu.memory_space<any>>) dst(%97 : memref<1x16xf32, #tpu.memory_space<vmem>>)
    %c5_i32_56 = arith.constant 5 : i32
    %c0_i32_57 = arith.constant 0 : i32
    %100 = tpu.memref_slice %arg1[%25, %c0_i32_57] : memref<50x16xf32, #tpu.memory_space<any>> -> memref<1x16xf32, #tpu.memory_space<any>>
    %c17_i32_58 = arith.constant 17 : i32
    %c0_i32_59 = arith.constant 0 : i32
    %101 = tpu.memref_slice %arg6[%c17_i32_58, %c0_i32_59] : memref<64x16xf32, #tpu.memory_space<vmem>> -> memref<1x16xf32, #tpu.memory_space<vmem>>
    %102 = tpu.memref_slice %arg8[%c5_i32_56] : memref<16x!tpu.dma_semaphore, #tpu.memory_space<semaphore_mem>> -> memref<1x!tpu.dma_semaphore, #tpu.memory_space<semaphore_mem>>
    %103 = tpu.memref_squeeze %102 : memref<1x!tpu.dma_semaphore, #tpu.memory_space<semaphore_mem>> -> memref<!tpu.dma_semaphore, #tpu.memory_space<semaphore_mem>>
    tpu.wait_dma2 semaphore(%103 : memref<!tpu.dma_semaphore, #tpu.memory_space<semaphore_mem>>) src(%100 : memref<1x16xf32, #tpu.memory_space<any>>) dst(%101 : memref<1x16xf32, #tpu.memory_space<vmem>>)
    %c6_i32_60 = arith.constant 6 : i32
    %c0_i32_61 = arith.constant 0 : i32
    %104 = tpu.memref_slice %arg1[%30, %c0_i32_61] : memref<50x16xf32, #tpu.memory_space<any>> -> memref<1x16xf32, #tpu.memory_space<any>>
    %c24_i32_62 = arith.constant 24 : i32
    %c0_i32_63 = arith.constant 0 : i32
    %105 = tpu.memref_slice %arg6[%c24_i32_62, %c0_i32_63] : memref<64x16xf32, #tpu.memory_space<vmem>> -> memref<1x16xf32, #tpu.memory_space<vmem>>
    %106 = tpu.memref_slice %arg8[%c6_i32_60] : memref<16x!tpu.dma_semaphore, #tpu.memory_space<semaphore_mem>> -> memref<1x!tpu.dma_semaphore, #tpu.memory_space<semaphore_mem>>
    %107 = tpu.memref_squeeze %106 : memref<1x!tpu.dma_semaphore, #tpu.memory_space<semaphore_mem>> -> memref<!tpu.dma_semaphore, #tpu.memory_space<semaphore_mem>>
    tpu.wait_dma2 semaphore(%107 : memref<!tpu.dma_semaphore, #tpu.memory_space<semaphore_mem>>) src(%104 : memref<1x16xf32, #tpu.memory_space<any>>) dst(%105 : memref<1x16xf32, #tpu.memory_space<vmem>>)
    %c7_i32_64 = arith.constant 7 : i32
    %c0_i32_65 = arith.constant 0 : i32
    %108 = tpu.memref_slice %arg1[%35, %c0_i32_65] : memref<50x16xf32, #tpu.memory_space<any>> -> memref<1x16xf32, #tpu.memory_space<any>>
    %c25_i32_66 = arith.constant 25 : i32
    %c0_i32_67 = arith.constant 0 : i32
    %109 = tpu.memref_slice %arg6[%c25_i32_66, %c0_i32_67] : memref<64x16xf32, #tpu.memory_space<vmem>> -> memref<1x16xf32, #tpu.memory_space<vmem>>
    %110 = tpu.memref_slice %arg8[%c7_i32_64] : memref<16x!tpu.dma_semaphore, #tpu.memory_space<semaphore_mem>> -> memref<1x!tpu.dma_semaphore, #tpu.memory_space<semaphore_mem>>
    %111 = tpu.memref_squeeze %110 : memref<1x!tpu.dma_semaphore, #tpu.memory_space<semaphore_mem>> -> memref<!tpu.dma_semaphore, #tpu.memory_space<semaphore_mem>>
    tpu.wait_dma2 semaphore(%111 : memref<!tpu.dma_semaphore, #tpu.memory_space<semaphore_mem>>) src(%108 : memref<1x16xf32, #tpu.memory_space<any>>) dst(%109 : memref<1x16xf32, #tpu.memory_space<vmem>>)
    %c8_i32_68 = arith.constant 8 : i32
    %c0_i32_69 = arith.constant 0 : i32
    %112 = tpu.memref_slice %arg1[%40, %c0_i32_69] : memref<50x16xf32, #tpu.memory_space<any>> -> memref<1x16xf32, #tpu.memory_space<any>>
    %c32_i32_70 = arith.constant 32 : i32
    %c0_i32_71 = arith.constant 0 : i32
    %113 = tpu.memref_slice %arg6[%c32_i32_70, %c0_i32_71] : memref<64x16xf32, #tpu.memory_space<vmem>> -> memref<1x16xf32, #tpu.memory_space<vmem>>
    %114 = tpu.memref_slice %arg8[%c8_i32_68] : memref<16x!tpu.dma_semaphore, #tpu.memory_space<semaphore_mem>> -> memref<1x!tpu.dma_semaphore, #tpu.memory_space<semaphore_mem>>
    %115 = tpu.memref_squeeze %114 : memref<1x!tpu.dma_semaphore, #tpu.memory_space<semaphore_mem>> -> memref<!tpu.dma_semaphore, #tpu.memory_space<semaphore_mem>>
    tpu.wait_dma2 semaphore(%115 : memref<!tpu.dma_semaphore, #tpu.memory_space<semaphore_mem>>) src(%112 : memref<1x16xf32, #tpu.memory_space<any>>) dst(%113 : memref<1x16xf32, #tpu.memory_space<vmem>>)
    %c9_i32_72 = arith.constant 9 : i32
    %c0_i32_73 = arith.constant 0 : i32
    %116 = tpu.memref_slice %arg1[%45, %c0_i32_73] : memref<50x16xf32, #tpu.memory_space<any>> -> memref<1x16xf32, #tpu.memory_space<any>>
    %c33_i32_74 = arith.constant 33 : i32
    %c0_i32_75 = arith.constant 0 : i32
    %117 = tpu.memref_slice %arg6[%c33_i32_74, %c0_i32_75] : memref<64x16xf32, #tpu.memory_space<vmem>> -> memref<1x16xf32, #tpu.memory_space<vmem>>
    %118 = tpu.memref_slice %arg8[%c9_i32_72] : memref<16x!tpu.dma_semaphore, #tpu.memory_space<semaphore_mem>> -> memref<1x!tpu.dma_semaphore, #tpu.memory_space<semaphore_mem>>
    %119 = tpu.memref_squeeze %118 : memref<1x!tpu.dma_semaphore, #tpu.memory_space<semaphore_mem>> -> memref<!tpu.dma_semaphore, #tpu.memory_space<semaphore_mem>>
    tpu.wait_dma2 semaphore(%119 : memref<!tpu.dma_semaphore, #tpu.memory_space<semaphore_mem>>) src(%116 : memref<1x16xf32, #tpu.memory_space<any>>) dst(%117 : memref<1x16xf32, #tpu.memory_space<vmem>>)
    %c10_i32_76 = arith.constant 10 : i32
    %c0_i32_77 = arith.constant 0 : i32
    %120 = tpu.memref_slice %arg1[%50, %c0_i32_77] : memref<50x16xf32, #tpu.memory_space<any>> -> memref<1x16xf32, #tpu.memory_space<any>>
    %c40_i32_78 = arith.constant 40 : i32
    %c0_i32_79 = arith.constant 0 : i32
    %121 = tpu.memref_slice %arg6[%c40_i32_78, %c0_i32_79] : memref<64x16xf32, #tpu.memory_space<vmem>> -> memref<1x16xf32, #tpu.memory_space<vmem>>
    %122 = tpu.memref_slice %arg8[%c10_i32_76] : memref<16x!tpu.dma_semaphore, #tpu.memory_space<semaphore_mem>> -> memref<1x!tpu.dma_semaphore, #tpu.memory_space<semaphore_mem>>
    %123 = tpu.memref_squeeze %122 : memref<1x!tpu.dma_semaphore, #tpu.memory_space<semaphore_mem>> -> memref<!tpu.dma_semaphore, #tpu.memory_space<semaphore_mem>>
    tpu.wait_dma2 semaphore(%123 : memref<!tpu.dma_semaphore, #tpu.memory_space<semaphore_mem>>) src(%120 : memref<1x16xf32, #tpu.memory_space<any>>) dst(%121 : memref<1x16xf32, #tpu.memory_space<vmem>>)
    %c11_i32_80 = arith.constant 11 : i32
    %c0_i32_81 = arith.constant 0 : i32
    %124 = tpu.memref_slice %arg1[%55, %c0_i32_81] : memref<50x16xf32, #tpu.memory_space<any>> -> memref<1x16xf32, #tpu.memory_space<any>>
    %c41_i32_82 = arith.constant 41 : i32
    %c0_i32_83 = arith.constant 0 : i32
    %125 = tpu.memref_slice %arg6[%c41_i32_82, %c0_i32_83] : memref<64x16xf32, #tpu.memory_space<vmem>> -> memref<1x16xf32, #tpu.memory_space<vmem>>
    %126 = tpu.memref_slice %arg8[%c11_i32_80] : memref<16x!tpu.dma_semaphore, #tpu.memory_space<semaphore_mem>> -> memref<1x!tpu.dma_semaphore, #tpu.memory_space<semaphore_mem>>
    %127 = tpu.memref_squeeze %126 : memref<1x!tpu.dma_semaphore, #tpu.memory_space<semaphore_mem>> -> memref<!tpu.dma_semaphore, #tpu.memory_space<semaphore_mem>>
    tpu.wait_dma2 semaphore(%127 : memref<!tpu.dma_semaphore, #tpu.memory_space<semaphore_mem>>) src(%124 : memref<1x16xf32, #tpu.memory_space<any>>) dst(%125 : memref<1x16xf32, #tpu.memory_space<vmem>>)
    %c12_i32_84 = arith.constant 12 : i32
    %c0_i32_85 = arith.constant 0 : i32
    %128 = tpu.memref_slice %arg1[%60, %c0_i32_85] : memref<50x16xf32, #tpu.memory_space<any>> -> memref<1x16xf32, #tpu.memory_space<any>>
    %c48_i32_86 = arith.constant 48 : i32
    %c0_i32_87 = arith.constant 0 : i32
    %129 = tpu.memref_slice %arg6[%c48_i32_86, %c0_i32_87] : memref<64x16xf32, #tpu.memory_space<vmem>> -> memref<1x16xf32, #tpu.memory_space<vmem>>
    %130 = tpu.memref_slice %arg8[%c12_i32_84] : memref<16x!tpu.dma_semaphore, #tpu.memory_space<semaphore_mem>> -> memref<1x!tpu.dma_semaphore, #tpu.memory_space<semaphore_mem>>
    %131 = tpu.memref_squeeze %130 : memref<1x!tpu.dma_semaphore, #tpu.memory_space<semaphore_mem>> -> memref<!tpu.dma_semaphore, #tpu.memory_space<semaphore_mem>>
    tpu.wait_dma2 semaphore(%131 : memref<!tpu.dma_semaphore, #tpu.memory_space<semaphore_mem>>) src(%128 : memref<1x16xf32, #tpu.memory_space<any>>) dst(%129 : memref<1x16xf32, #tpu.memory_space<vmem>>)
    %c13_i32_88 = arith.constant 13 : i32
    %c0_i32_89 = arith.constant 0 : i32
    %132 = tpu.memref_slice %arg1[%65, %c0_i32_89] : memref<50x16xf32, #tpu.memory_space<any>> -> memref<1x16xf32, #tpu.memory_space<any>>
    %c49_i32_90 = arith.constant 49 : i32
    %c0_i32_91 = arith.constant 0 : i32
    %133 = tpu.memref_slice %arg6[%c49_i32_90, %c0_i32_91] : memref<64x16xf32, #tpu.memory_space<vmem>> -> memref<1x16xf32, #tpu.memory_space<vmem>>
    %134 = tpu.memref_slice %arg8[%c13_i32_88] : memref<16x!tpu.dma_semaphore, #tpu.memory_space<semaphore_mem>> -> memref<1x!tpu.dma_semaphore, #tpu.memory_space<semaphore_mem>>
    %135 = tpu.memref_squeeze %134 : memref<1x!tpu.dma_semaphore, #tpu.memory_space<semaphore_mem>> -> memref<!tpu.dma_semaphore, #tpu.memory_space<semaphore_mem>>
    tpu.wait_dma2 semaphore(%135 : memref<!tpu.dma_semaphore, #tpu.memory_space<semaphore_mem>>) src(%132 : memref<1x16xf32, #tpu.memory_space<any>>) dst(%133 : memref<1x16xf32, #tpu.memory_space<vmem>>)
    %c14_i32_92 = arith.constant 14 : i32
    %c0_i32_93 = arith.constant 0 : i32
    %136 = tpu.memref_slice %arg1[%70, %c0_i32_93] : memref<50x16xf32, #tpu.memory_space<any>> -> memref<1x16xf32, #tpu.memory_space<any>>
    %c56_i32_94 = arith.constant 56 : i32
    %c0_i32_95 = arith.constant 0 : i32
    %137 = tpu.memref_slice %arg6[%c56_i32_94, %c0_i32_95] : memref<64x16xf32, #tpu.memory_space<vmem>> -> memref<1x16xf32, #tpu.memory_space<vmem>>
    %138 = tpu.memref_slice %arg8[%c14_i32_92] : memref<16x!tpu.dma_semaphore, #tpu.memory_space<semaphore_mem>> -> memref<1x!tpu.dma_semaphore, #tpu.memory_space<semaphore_mem>>
    %139 = tpu.memref_squeeze %138 : memref<1x!tpu.dma_semaphore, #tpu.memory_space<semaphore_mem>> -> memref<!tpu.dma_semaphore, #tpu.memory_space<semaphore_mem>>
    tpu.wait_dma2 semaphore(%139 : memref<!tpu.dma_semaphore, #tpu.memory_space<semaphore_mem>>) src(%136 : memref<1x16xf32, #tpu.memory_space<any>>) dst(%137 : memref<1x16xf32, #tpu.memory_space<vmem>>)
    %c15_i32_96 = arith.constant 15 : i32
    %c0_i32_97 = arith.constant 0 : i32
    %140 = tpu.memref_slice %arg1[%75, %c0_i32_97] : memref<50x16xf32, #tpu.memory_space<any>> -> memref<1x16xf32, #tpu.memory_space<any>>
    %c57_i32_98 = arith.constant 57 : i32
    %c0_i32_99 = arith.constant 0 : i32
    %141 = tpu.memref_slice %arg6[%c57_i32_98, %c0_i32_99] : memref<64x16xf32, #tpu.memory_space<vmem>> -> memref<1x16xf32, #tpu.memory_space<vmem>>
    %142 = tpu.memref_slice %arg8[%c15_i32_96] : memref<16x!tpu.dma_semaphore, #tpu.memory_space<semaphore_mem>> -> memref<1x!tpu.dma_semaphore, #tpu.memory_space<semaphore_mem>>
    %143 = tpu.memref_squeeze %142 : memref<1x!tpu.dma_semaphore, #tpu.memory_space<semaphore_mem>> -> memref<!tpu.dma_semaphore, #tpu.memory_space<semaphore_mem>>
    tpu.wait_dma2 semaphore(%143 : memref<!tpu.dma_semaphore, #tpu.memory_space<semaphore_mem>>) src(%140 : memref<1x16xf32, #tpu.memory_space<any>>) dst(%141 : memref<1x16xf32, #tpu.memory_space<vmem>>)
    %c0_100 = arith.constant 0 : index
    %c0_101 = arith.constant 0 : index
    %144 = vector.load %arg6[%c0_100, %c0_101] : memref<64x16xf32, #tpu.memory_space<vmem>>, vector<64x16xf32>
    %145 = arith.truncf %144 : vector<64x16xf32> to vector<64x16xbf16>
    %c0_102 = arith.constant 0 : index
    %c0_103 = arith.constant 0 : index
    %146 = vector.load %arg2[%c0_102, %c0_103] : memref<16x128xbf16, #tpu.memory_space<vmem>>, vector<16x128xbf16>
    %cst = arith.constant dense<0.000000e+00> : vector<64x128xf32>
    %147 = tpu.matmul %145, %146, %cst {dimension_numbers = #tpu.dot_dimension_numbers<[1], [0], [0], [1], [0, 0, 1, 1], [], []>} : vector<64x16xbf16>, vector<16x128xbf16>, vector<64x128xf32> -> vector<64x128xf32>
    %c0_104 = arith.constant 0 : index
    %c0_105 = arith.constant 0 : index
    %148 = vector.load %arg4[%c0_104, %c0_105] : memref<1x128xf32, #tpu.memory_space<vmem>>, vector<1x128xf32>
    %149 = vector.broadcast %148 : vector<1x128xf32> to vector<64x128xf32>
    %150 = arith.addf %147, %149 : vector<64x128xf32>
    %c0_106 = arith.constant 0 : index
    %c0_107 = arith.constant 0 : index
    %151 = vector.load %arg7[%c0_106, %c0_107] : memref<64x128xf32, #tpu.memory_space<vmem>>, vector<64x128xf32>
    tpu.vector_store %arg7[%c0_106, %c0_107], %150 {strides = array<i32>} : memref<64x128xf32, #tpu.memory_space<vmem>>, vector<64x128xf32>,
    %cst_108 = arith.constant 0.000000e+00 : f32
    %152 = vector.broadcast %cst_108 : f32 to vector<8x32xf32>
    %cst_109 = arith.constant 0.000000e+00 : f32
    %153 = vector.broadcast %cst_109 : f32 to vector<8x32xf32>
    %c0_i32_110 = arith.constant 0 : i32
    %c8_i32_111 = arith.constant 8 : i32
    %154 = arith.muli %c0_i32_110, %c8_i32_111 : i32
    %155 = tpu.assume_multiple %154, 8 : i32
    %156 = arith.index_cast %155 : i32 to index
    %c0_112 = arith.constant 0 : index
    %157 = vector.load %arg7[%156, %c0_112] : memref<64x128xf32, #tpu.memory_space<vmem>>, vector<8x128xf32>
    %158 = arith.truncf %152 : vector<8x32xf32> to vector<8x32xbf16>
    %c0_113 = arith.constant 0 : index
    %c0_114 = arith.constant 0 : index
    %159 = vector.load %arg3[%c0_113, %c0_114] : memref<32x128xbf16, #tpu.memory_space<vmem>>, vector<32x128xbf16>
    %cst_115 = arith.constant dense<0.000000e+00> : vector<8x128xf32>
    %160 = tpu.matmul %158, %159, %cst_115 {dimension_numbers = #tpu.dot_dimension_numbers<[1], [0], [0], [1], [0, 0, 1, 1], [], []>} : vector<8x32xbf16>, vector<32x128xbf16>, vector<8x128xf32> -> vector<8x128xf32>
    %161 = arith.addf %157, %160 : vector<8x128xf32>
    %162 = vector.extract_strided_slice %161 {offsets = [0, 0], sizes = [8, 32], strides = [1, 1]} : vector<8x128xf32> to vector<8x32xf32>
    %163 = arith.negf %162 : vector<8x32xf32>
    %164 = math.exp %163 : vector<8x32xf32>
    %cst_116 = arith.constant 1.000000e+00 : f32
    %165 = vector.broadcast %cst_116 : f32 to vector<8x32xf32>
    %166 = arith.addf %165, %164 : vector<8x32xf32>
    %167 = arith.divf %165, %166 : vector<8x32xf32>
    %168 = vector.extract_strided_slice %161 {offsets = [0, 32], sizes = [8, 32], strides = [1, 1]} : vector<8x128xf32> to vector<8x32xf32>
    %169 = arith.negf %168 : vector<8x32xf32>
    %170 = math.exp %169 : vector<8x32xf32>
    %cst_117 = arith.constant 1.000000e+00 : f32
    %171 = vector.broadcast %cst_117 : f32 to vector<8x32xf32>
    %172 = arith.addf %171, %170 : vector<8x32xf32>
    %173 = arith.divf %171, %172 : vector<8x32xf32>
    %174 = vector.extract_strided_slice %161 {offsets = [0, 64], sizes = [8, 32], strides = [1, 1]} : vector<8x128xf32> to vector<8x32xf32>
    %175 = math.tanh %174 : vector<8x32xf32>
    %176 = vector.extract_strided_slice %161 {offsets = [0, 96], sizes = [8, 32], strides = [1, 1]} : vector<8x128xf32> to vector<8x32xf32>
    %177 = arith.negf %176 : vector<8x32xf32>
    %178 = math.exp %177 : vector<8x32xf32>
    %cst_118 = arith.constant 1.000000e+00 : f32
    %179 = vector.broadcast %cst_118 : f32 to vector<8x32xf32>
    %180 = arith.addf %179, %178 : vector<8x32xf32>
    %181 = arith.divf %179, %180 : vector<8x32xf32>
    %182 = arith.mulf %173, %153 : vector<8x32xf32>
    %183 = arith.mulf %167, %175 : vector<8x32xf32>
    %184 = arith.addf %182, %183 : vector<8x32xf32>
    %185 = math.tanh %184 : vector<8x32xf32>
    %186 = arith.mulf %181, %185 : vector<8x32xf32>
    %c1_i32_119 = arith.constant 1 : i32
    %c8_i32_120 = arith.constant 8 : i32
    %187 = arith.muli %c1_i32_119, %c8_i32_120 : i32
    %188 = tpu.assume_multiple %187, 8 : i32
    %189 = arith.index_cast %188 : i32 to index
    %c0_121 = arith.constant 0 : index
    %190 = vector.load %arg7[%189, %c0_121] : memref<64x128xf32, #tpu.memory_space<vmem>>, vector<8x128xf32>
    %191 = arith.truncf %186 : vector<8x32xf32> to vector<8x32xbf16>
    %c0_122 = arith.constant 0 : index
    %c0_123 = arith.constant 0 : index
    %192 = vector.load %arg3[%c0_122, %c0_123] : memref<32x128xbf16, #tpu.memory_space<vmem>>, vector<32x128xbf16>
    %cst_124 = arith.constant dense<0.000000e+00> : vector<8x128xf32>
    %193 = tpu.matmul %191, %192, %cst_124 {dimension_numbers = #tpu.dot_dimension_numbers<[1], [0], [0], [1], [0, 0, 1, 1], [], []>} : vector<8x32xbf16>, vector<32x128xbf16>, vector<8x128xf32> -> vector<8x128xf32>
    %194 = arith.addf %190, %193 : vector<8x128xf32>
    %195 = vector.extract_strided_slice %194 {offsets = [0, 0], sizes = [8, 32], strides = [1, 1]} : vector<8x128xf32> to vector<8x32xf32>
    %196 = arith.negf %195 : vector<8x32xf32>
    %197 = math.exp %196 : vector<8x32xf32>
    %cst_125 = arith.constant 1.000000e+00 : f32
    %198 = vector.broadcast %cst_125 : f32 to vector<8x32xf32>
    %199 = arith.addf %198, %197 : vector<8x32xf32>
    %200 = arith.divf %198, %199 : vector<8x32xf32>
    %201 = vector.extract_strided_slice %194 {offsets = [0, 32], sizes = [8, 32], strides = [1, 1]} : vector<8x128xf32> to vector<8x32xf32>
    %202 = arith.negf %201 : vector<8x32xf32>
    %203 = math.exp %202 : vector<8x32xf32>
    %cst_126 = arith.constant 1.000000e+00 : f32
    %204 = vector.broadcast %cst_126 : f32 to vector<8x32xf32>
    %205 = arith.addf %204, %203 : vector<8x32xf32>
    %206 = arith.divf %204, %205 : vector<8x32xf32>
    %207 = vector.extract_strided_slice %194 {offsets = [0, 64], sizes = [8, 32], strides = [1, 1]} : vector<8x128xf32> to vector<8x32xf32>
    %208 = math.tanh %207 : vector<8x32xf32>
    %209 = vector.extract_strided_slice %194 {offsets = [0, 96], sizes = [8, 32], strides = [1, 1]} : vector<8x128xf32> to vector<8x32xf32>
    %210 = arith.negf %209 : vector<8x32xf32>
    %211 = math.exp %210 : vector<8x32xf32>
    %cst_127 = arith.constant 1.000000e+00 : f32
    %212 = vector.broadcast %cst_127 : f32 to vector<8x32xf32>
    %213 = arith.addf %212, %211 : vector<8x32xf32>
    %214 = arith.divf %212, %213 : vector<8x32xf32>
    %215 = arith.mulf %206, %184 : vector<8x32xf32>
    %216 = arith.mulf %200, %208 : vector<8x32xf32>
    %217 = arith.addf %215, %216 : vector<8x32xf32>
    %218 = math.tanh %217 : vector<8x32xf32>
    %219 = arith.mulf %214, %218 : vector<8x32xf32>
    %c2_i32_128 = arith.constant 2 : i32
    %c8_i32_129 = arith.constant 8 : i32
    %220 = arith.muli %c2_i32_128, %c8_i32_129 : i32
    %221 = tpu.assume_multiple %220, 8 : i32
    %222 = arith.index_cast %221 : i32 to index
    %c0_130 = arith.constant 0 : index
    %223 = vector.load %arg7[%222, %c0_130] : memref<64x128xf32, #tpu.memory_space<vmem>>, vector<8x128xf32>
    %224 = arith.truncf %219 : vector<8x32xf32> to vector<8x32xbf16>
    %c0_131 = arith.constant 0 : index
    %c0_132 = arith.constant 0 : index
    %225 = vector.load %arg3[%c0_131, %c0_132] : memref<32x128xbf16, #tpu.memory_space<vmem>>, vector<32x128xbf16>
    %cst_133 = arith.constant dense<0.000000e+00> : vector<8x128xf32>
    %226 = tpu.matmul %224, %225, %cst_133 {dimension_numbers = #tpu.dot_dimension_numbers<[1], [0], [0], [1], [0, 0, 1, 1], [], []>} : vector<8x32xbf16>, vector<32x128xbf16>, vector<8x128xf32> -> vector<8x128xf32>
    %227 = arith.addf %223, %226 : vector<8x128xf32>
    %228 = vector.extract_strided_slice %227 {offsets = [0, 0], sizes = [8, 32], strides = [1, 1]} : vector<8x128xf32> to vector<8x32xf32>
    %229 = arith.negf %228 : vector<8x32xf32>
    %230 = math.exp %229 : vector<8x32xf32>
    %cst_134 = arith.constant 1.000000e+00 : f32
    %231 = vector.broadcast %cst_134 : f32 to vector<8x32xf32>
    %232 = arith.addf %231, %230 : vector<8x32xf32>
    %233 = arith.divf %231, %232 : vector<8x32xf32>
    %234 = vector.extract_strided_slice %227 {offsets = [0, 32], sizes = [8, 32], strides = [1, 1]} : vector<8x128xf32> to vector<8x32xf32>
    %235 = arith.negf %234 : vector<8x32xf32>
    %236 = math.exp %235 : vector<8x32xf32>
    %cst_135 = arith.constant 1.000000e+00 : f32
    %237 = vector.broadcast %cst_135 : f32 to vector<8x32xf32>
    %238 = arith.addf %237, %236 : vector<8x32xf32>
    %239 = arith.divf %237, %238 : vector<8x32xf32>
    %240 = vector.extract_strided_slice %227 {offsets = [0, 64], sizes = [8, 32], strides = [1, 1]} : vector<8x128xf32> to vector<8x32xf32>
    %241 = math.tanh %240 : vector<8x32xf32>
    %242 = vector.extract_strided_slice %227 {offsets = [0, 96], sizes = [8, 32], strides = [1, 1]} : vector<8x128xf32> to vector<8x32xf32>
    %243 = arith.negf %242 : vector<8x32xf32>
    %244 = math.exp %243 : vector<8x32xf32>
    %cst_136 = arith.constant 1.000000e+00 : f32
    %245 = vector.broadcast %cst_136 : f32 to vector<8x32xf32>
    %246 = arith.addf %245, %244 : vector<8x32xf32>
    %247 = arith.divf %245, %246 : vector<8x32xf32>
    %248 = arith.mulf %239, %217 : vector<8x32xf32>
    %249 = arith.mulf %233, %241 : vector<8x32xf32>
    %250 = arith.addf %248, %249 : vector<8x32xf32>
    %251 = math.tanh %250 : vector<8x32xf32>
    %252 = arith.mulf %247, %251 : vector<8x32xf32>
    %c3_i32_137 = arith.constant 3 : i32
    %c8_i32_138 = arith.constant 8 : i32
    %253 = arith.muli %c3_i32_137, %c8_i32_138 : i32
    %254 = tpu.assume_multiple %253, 8 : i32
    %255 = arith.index_cast %254 : i32 to index
    %c0_139 = arith.constant 0 : index
    %256 = vector.load %arg7[%255, %c0_139] : memref<64x128xf32, #tpu.memory_space<vmem>>, vector<8x128xf32>
    %257 = arith.truncf %252 : vector<8x32xf32> to vector<8x32xbf16>
    %c0_140 = arith.constant 0 : index
    %c0_141 = arith.constant 0 : index
    %258 = vector.load %arg3[%c0_140, %c0_141] : memref<32x128xbf16, #tpu.memory_space<vmem>>, vector<32x128xbf16>
    %cst_142 = arith.constant dense<0.000000e+00> : vector<8x128xf32>
    %259 = tpu.matmul %257, %258, %cst_142 {dimension_numbers = #tpu.dot_dimension_numbers<[1], [0], [0], [1], [0, 0, 1, 1], [], []>} : vector<8x32xbf16>, vector<32x128xbf16>, vector<8x128xf32> -> vector<8x128xf32>
    %260 = arith.addf %256, %259 : vector<8x128xf32>
    %261 = vector.extract_strided_slice %260 {offsets = [0, 0], sizes = [8, 32], strides = [1, 1]} : vector<8x128xf32> to vector<8x32xf32>
    %262 = arith.negf %261 : vector<8x32xf32>
    %263 = math.exp %262 : vector<8x32xf32>
    %cst_143 = arith.constant 1.000000e+00 : f32
    %264 = vector.broadcast %cst_143 : f32 to vector<8x32xf32>
    %265 = arith.addf %264, %263 : vector<8x32xf32>
    %266 = arith.divf %264, %265 : vector<8x32xf32>
    %267 = vector.extract_strided_slice %260 {offsets = [0, 32], sizes = [8, 32], strides = [1, 1]} : vector<8x128xf32> to vector<8x32xf32>
    %268 = arith.negf %267 : vector<8x32xf32>
    %269 = math.exp %268 : vector<8x32xf32>
    %cst_144 = arith.constant 1.000000e+00 : f32
    %270 = vector.broadcast %cst_144 : f32 to vector<8x32xf32>
    %271 = arith.addf %270, %269 : vector<8x32xf32>
    %272 = arith.divf %270, %271 : vector<8x32xf32>
    %273 = vector.extract_strided_slice %260 {offsets = [0, 64], sizes = [8, 32], strides = [1, 1]} : vector<8x128xf32> to vector<8x32xf32>
    %274 = math.tanh %273 : vector<8x32xf32>
    %275 = vector.extract_strided_slice %260 {offsets = [0, 96], sizes = [8, 32], strides = [1, 1]} : vector<8x128xf32> to vector<8x32xf32>
    %276 = arith.negf %275 : vector<8x32xf32>
    %277 = math.exp %276 : vector<8x32xf32>
    %cst_145 = arith.constant 1.000000e+00 : f32
    %278 = vector.broadcast %cst_145 : f32 to vector<8x32xf32>
    %279 = arith.addf %278, %277 : vector<8x32xf32>
    %280 = arith.divf %278, %279 : vector<8x32xf32>
    %281 = arith.mulf %272, %250 : vector<8x32xf32>
    %282 = arith.mulf %266, %274 : vector<8x32xf32>
    %283 = arith.addf %281, %282 : vector<8x32xf32>
    %284 = math.tanh %283 : vector<8x32xf32>
    %285 = arith.mulf %280, %284 : vector<8x32xf32>
    %c4_i32_146 = arith.constant 4 : i32
    %c8_i32_147 = arith.constant 8 : i32
    %286 = arith.muli %c4_i32_146, %c8_i32_147 : i32
    %287 = tpu.assume_multiple %286, 8 : i32
    %288 = arith.index_cast %287 : i32 to index
    %c0_148 = arith.constant 0 : index
    %289 = vector.load %arg7[%288, %c0_148] : memref<64x128xf32, #tpu.memory_space<vmem>>, vector<8x128xf32>
    %290 = arith.truncf %285 : vector<8x32xf32> to vector<8x32xbf16>
    %c0_149 = arith.constant 0 : index
    %c0_150 = arith.constant 0 : index
    %291 = vector.load %arg3[%c0_149, %c0_150] : memref<32x128xbf16, #tpu.memory_space<vmem>>, vector<32x128xbf16>
    %cst_151 = arith.constant dense<0.000000e+00> : vector<8x128xf32>
    %292 = tpu.matmul %290, %291, %cst_151 {dimension_numbers = #tpu.dot_dimension_numbers<[1], [0], [0], [1], [0, 0, 1, 1], [], []>} : vector<8x32xbf16>, vector<32x128xbf16>, vector<8x128xf32> -> vector<8x128xf32>
    %293 = arith.addf %289, %292 : vector<8x128xf32>
    %294 = vector.extract_strided_slice %293 {offsets = [0, 0], sizes = [8, 32], strides = [1, 1]} : vector<8x128xf32> to vector<8x32xf32>
    %295 = arith.negf %294 : vector<8x32xf32>
    %296 = math.exp %295 : vector<8x32xf32>
    %cst_152 = arith.constant 1.000000e+00 : f32
    %297 = vector.broadcast %cst_152 : f32 to vector<8x32xf32>
    %298 = arith.addf %297, %296 : vector<8x32xf32>
    %299 = arith.divf %297, %298 : vector<8x32xf32>
    %300 = vector.extract_strided_slice %293 {offsets = [0, 32], sizes = [8, 32], strides = [1, 1]} : vector<8x128xf32> to vector<8x32xf32>
    %301 = arith.negf %300 : vector<8x32xf32>
    %302 = math.exp %301 : vector<8x32xf32>
    %cst_153 = arith.constant 1.000000e+00 : f32
    %303 = vector.broadcast %cst_153 : f32 to vector<8x32xf32>
    %304 = arith.addf %303, %302 : vector<8x32xf32>
    %305 = arith.divf %303, %304 : vector<8x32xf32>
    %306 = vector.extract_strided_slice %293 {offsets = [0, 64], sizes = [8, 32], strides = [1, 1]} : vector<8x128xf32> to vector<8x32xf32>
    %307 = math.tanh %306 : vector<8x32xf32>
    %308 = vector.extract_strided_slice %293 {offsets = [0, 96], sizes = [8, 32], strides = [1, 1]} : vector<8x128xf32> to vector<8x32xf32>
    %309 = arith.negf %308 : vector<8x32xf32>
    %310 = math.exp %309 : vector<8x32xf32>
    %cst_154 = arith.constant 1.000000e+00 : f32
    %311 = vector.broadcast %cst_154 : f32 to vector<8x32xf32>
    %312 = arith.addf %311, %310 : vector<8x32xf32>
    %313 = arith.divf %311, %312 : vector<8x32xf32>
    %314 = arith.mulf %305, %283 : vector<8x32xf32>
    %315 = arith.mulf %299, %307 : vector<8x32xf32>
    %316 = arith.addf %314, %315 : vector<8x32xf32>
    %317 = math.tanh %316 : vector<8x32xf32>
    %318 = arith.mulf %313, %317 : vector<8x32xf32>
    %c5_i32_155 = arith.constant 5 : i32
    %c8_i32_156 = arith.constant 8 : i32
    %319 = arith.muli %c5_i32_155, %c8_i32_156 : i32
    %320 = tpu.assume_multiple %319, 8 : i32
    %321 = arith.index_cast %320 : i32 to index
    %c0_157 = arith.constant 0 : index
    %322 = vector.load %arg7[%321, %c0_157] : memref<64x128xf32, #tpu.memory_space<vmem>>, vector<8x128xf32>
    %323 = arith.truncf %318 : vector<8x32xf32> to vector<8x32xbf16>
    %c0_158 = arith.constant 0 : index
    %c0_159 = arith.constant 0 : index
    %324 = vector.load %arg3[%c0_158, %c0_159] : memref<32x128xbf16, #tpu.memory_space<vmem>>, vector<32x128xbf16>
    %cst_160 = arith.constant dense<0.000000e+00> : vector<8x128xf32>
    %325 = tpu.matmul %323, %324, %cst_160 {dimension_numbers = #tpu.dot_dimension_numbers<[1], [0], [0], [1], [0, 0, 1, 1], [], []>} : vector<8x32xbf16>, vector<32x128xbf16>, vector<8x128xf32> -> vector<8x128xf32>
    %326 = arith.addf %322, %325 : vector<8x128xf32>
    %327 = vector.extract_strided_slice %326 {offsets = [0, 0], sizes = [8, 32], strides = [1, 1]} : vector<8x128xf32> to vector<8x32xf32>
    %328 = arith.negf %327 : vector<8x32xf32>
    %329 = math.exp %328 : vector<8x32xf32>
    %cst_161 = arith.constant 1.000000e+00 : f32
    %330 = vector.broadcast %cst_161 : f32 to vector<8x32xf32>
    %331 = arith.addf %330, %329 : vector<8x32xf32>
    %332 = arith.divf %330, %331 : vector<8x32xf32>
    %333 = vector.extract_strided_slice %326 {offsets = [0, 32], sizes = [8, 32], strides = [1, 1]} : vector<8x128xf32> to vector<8x32xf32>
    %334 = arith.negf %333 : vector<8x32xf32>
    %335 = math.exp %334 : vector<8x32xf32>
    %cst_162 = arith.constant 1.000000e+00 : f32
    %336 = vector.broadcast %cst_162 : f32 to vector<8x32xf32>
    %337 = arith.addf %336, %335 : vector<8x32xf32>
    %338 = arith.divf %336, %337 : vector<8x32xf32>
    %339 = vector.extract_strided_slice %326 {offsets = [0, 64], sizes = [8, 32], strides = [1, 1]} : vector<8x128xf32> to vector<8x32xf32>
    %340 = math.tanh %339 : vector<8x32xf32>
    %341 = vector.extract_strided_slice %326 {offsets = [0, 96], sizes = [8, 32], strides = [1, 1]} : vector<8x128xf32> to vector<8x32xf32>
    %342 = arith.negf %341 : vector<8x32xf32>
    %343 = math.exp %342 : vector<8x32xf32>
    %cst_163 = arith.constant 1.000000e+00 : f32
    %344 = vector.broadcast %cst_163 : f32 to vector<8x32xf32>
    %345 = arith.addf %344, %343 : vector<8x32xf32>
    %346 = arith.divf %344, %345 : vector<8x32xf32>
    %347 = arith.mulf %338, %316 : vector<8x32xf32>
    %348 = arith.mulf %332, %340 : vector<8x32xf32>
    %349 = arith.addf %347, %348 : vector<8x32xf32>
    %350 = math.tanh %349 : vector<8x32xf32>
    %351 = arith.mulf %346, %350 : vector<8x32xf32>
    %c6_i32_164 = arith.constant 6 : i32
    %c8_i32_165 = arith.constant 8 : i32
    %352 = arith.muli %c6_i32_164, %c8_i32_165 : i32
    %353 = tpu.assume_multiple %352, 8 : i32
    %354 = arith.index_cast %353 : i32 to index
    %c0_166 = arith.constant 0 : index
    %355 = vector.load %arg7[%354, %c0_166] : memref<64x128xf32, #tpu.memory_space<vmem>>, vector<8x128xf32>
    %356 = arith.truncf %351 : vector<8x32xf32> to vector<8x32xbf16>
    %c0_167 = arith.constant 0 : index
    %c0_168 = arith.constant 0 : index
    %357 = vector.load %arg3[%c0_167, %c0_168] : memref<32x128xbf16, #tpu.memory_space<vmem>>, vector<32x128xbf16>
    %cst_169 = arith.constant dense<0.000000e+00> : vector<8x128xf32>
    %358 = tpu.matmul %356, %357, %cst_169 {dimension_numbers = #tpu.dot_dimension_numbers<[1], [0], [0], [1], [0, 0, 1, 1], [], []>} : vector<8x32xbf16>, vector<32x128xbf16>, vector<8x128xf32> -> vector<8x128xf32>
    %359 = arith.addf %355, %358 : vector<8x128xf32>
    %360 = vector.extract_strided_slice %359 {offsets = [0, 0], sizes = [8, 32], strides = [1, 1]} : vector<8x128xf32> to vector<8x32xf32>
    %361 = arith.negf %360 : vector<8x32xf32>
    %362 = math.exp %361 : vector<8x32xf32>
    %cst_170 = arith.constant 1.000000e+00 : f32
    %363 = vector.broadcast %cst_170 : f32 to vector<8x32xf32>
    %364 = arith.addf %363, %362 : vector<8x32xf32>
    %365 = arith.divf %363, %364 : vector<8x32xf32>
    %366 = vector.extract_strided_slice %359 {offsets = [0, 32], sizes = [8, 32], strides = [1, 1]} : vector<8x128xf32> to vector<8x32xf32>
    %367 = arith.negf %366 : vector<8x32xf32>
    %368 = math.exp %367 : vector<8x32xf32>
    %cst_171 = arith.constant 1.000000e+00 : f32
    %369 = vector.broadcast %cst_171 : f32 to vector<8x32xf32>
    %370 = arith.addf %369, %368 : vector<8x32xf32>
    %371 = arith.divf %369, %370 : vector<8x32xf32>
    %372 = vector.extract_strided_slice %359 {offsets = [0, 64], sizes = [8, 32], strides = [1, 1]} : vector<8x128xf32> to vector<8x32xf32>
    %373 = math.tanh %372 : vector<8x32xf32>
    %374 = vector.extract_strided_slice %359 {offsets = [0, 96], sizes = [8, 32], strides = [1, 1]} : vector<8x128xf32> to vector<8x32xf32>
    %375 = arith.negf %374 : vector<8x32xf32>
    %376 = math.exp %375 : vector<8x32xf32>
    %cst_172 = arith.constant 1.000000e+00 : f32
    %377 = vector.broadcast %cst_172 : f32 to vector<8x32xf32>
    %378 = arith.addf %377, %376 : vector<8x32xf32>
    %379 = arith.divf %377, %378 : vector<8x32xf32>
    %380 = arith.mulf %371, %349 : vector<8x32xf32>
    %381 = arith.mulf %365, %373 : vector<8x32xf32>
    %382 = arith.addf %380, %381 : vector<8x32xf32>
    %383 = math.tanh %382 : vector<8x32xf32>
    %384 = arith.mulf %379, %383 : vector<8x32xf32>
    %c7_i32_173 = arith.constant 7 : i32
    %c8_i32_174 = arith.constant 8 : i32
    %385 = arith.muli %c7_i32_173, %c8_i32_174 : i32
    %386 = tpu.assume_multiple %385, 8 : i32
    %387 = arith.index_cast %386 : i32 to index
    %c0_175 = arith.constant 0 : index
    %388 = vector.load %arg7[%387, %c0_175] : memref<64x128xf32, #tpu.memory_space<vmem>>, vector<8x128xf32>
    %389 = arith.truncf %384 : vector<8x32xf32> to vector<8x32xbf16>
    %c0_176 = arith.constant 0 : index
    %c0_177 = arith.constant 0 : index
    %390 = vector.load %arg3[%c0_176, %c0_177] : memref<32x128xbf16, #tpu.memory_space<vmem>>, vector<32x128xbf16>
    %cst_178 = arith.constant dense<0.000000e+00> : vector<8x128xf32>
    %391 = tpu.matmul %389, %390, %cst_178 {dimension_numbers = #tpu.dot_dimension_numbers<[1], [0], [0], [1], [0, 0, 1, 1], [], []>} : vector<8x32xbf16>, vector<32x128xbf16>, vector<8x128xf32> -> vector<8x128xf32>
    %392 = arith.addf %388, %391 : vector<8x128xf32>
    %393 = vector.extract_strided_slice %392 {offsets = [0, 0], sizes = [8, 32], strides = [1, 1]} : vector<8x128xf32> to vector<8x32xf32>
    %394 = arith.negf %393 : vector<8x32xf32>
    %395 = math.exp %394 : vector<8x32xf32>
    %cst_179 = arith.constant 1.000000e+00 : f32
    %396 = vector.broadcast %cst_179 : f32 to vector<8x32xf32>
    %397 = arith.addf %396, %395 : vector<8x32xf32>
    %398 = arith.divf %396, %397 : vector<8x32xf32>
    %399 = vector.extract_strided_slice %392 {offsets = [0, 32], sizes = [8, 32], strides = [1, 1]} : vector<8x128xf32> to vector<8x32xf32>
    %400 = arith.negf %399 : vector<8x32xf32>
    %401 = math.exp %400 : vector<8x32xf32>
    %cst_180 = arith.constant 1.000000e+00 : f32
    %402 = vector.broadcast %cst_180 : f32 to vector<8x32xf32>
    %403 = arith.addf %402, %401 : vector<8x32xf32>
    %404 = arith.divf %402, %403 : vector<8x32xf32>
    %405 = vector.extract_strided_slice %392 {offsets = [0, 64], sizes = [8, 32], strides = [1, 1]} : vector<8x128xf32> to vector<8x32xf32>
    %406 = math.tanh %405 : vector<8x32xf32>
    %407 = vector.extract_strided_slice %392 {offsets = [0, 96], sizes = [8, 32], strides = [1, 1]} : vector<8x128xf32> to vector<8x32xf32>
    %408 = arith.negf %407 : vector<8x32xf32>
    %409 = math.exp %408 : vector<8x32xf32>
    %cst_181 = arith.constant 1.000000e+00 : f32
    %410 = vector.broadcast %cst_181 : f32 to vector<8x32xf32>
    %411 = arith.addf %410, %409 : vector<8x32xf32>
    %412 = arith.divf %410, %411 : vector<8x32xf32>
    %413 = arith.mulf %404, %382 : vector<8x32xf32>
    %414 = arith.mulf %398, %406 : vector<8x32xf32>
    %415 = arith.addf %413, %414 : vector<8x32xf32>
    %416 = math.tanh %415 : vector<8x32xf32>
    %417 = arith.mulf %412, %416 : vector<8x32xf32>
    %c8_i32_182 = arith.constant 8 : i32
    %c0_183 = arith.constant 0 : index
    %c0_184 = arith.constant 0 : index
    %418 = vector.load %arg5[%c0_183, %c0_184] : memref<8x32xf32, #tpu.memory_space<vmem>>, vector<8x32xf32>
    tpu.vector_store %arg5[%c0_183, %c0_184], %417 {strides = array<i32>} : memref<8x32xf32, #tpu.memory_space<vmem>>, vector<8x32xf32>,
    return
  }
}

</mosaic_0001>

<bundles_post_ra>
// kernel: tpu_custom_call.1
= control target key start
LH: loop header
LB: loop body
LE: loop exit
PB: predicated region body
PF: predicated region fallthrough
CT: control target
= control target key end

     0   :  { %10 = vsyncpa [#allocation7], 0  ;;  %s2408_s0 = inlined_call_operand.vmem [shape: s32[16], index: 0, kind: input, shape index: {}]   ;;  %s2409_s1 = inlined_call_operand.vmem [shape: f32[50,16], index: 1, kind: input, shape index: {}]   ;;  %s2410_s2 = inlined_call_operand.vmem [shape: bf16[16,128], index: 2, kind: input, shape index: {}]   ;;  %s2411_s3 = inlined_call_operand.vmem [shape: bf16[32,128], index: 3, kind: input, shape index: {}]   ;;  %s2412_s4 = inlined_call_operand.vmem [shape: f32[1,128], index: 4, kind: input, shape index: {}]   ;;  %s2413_s5 = inlined_call_operand.hbm [shape: f32[8,32], index: 5, kind: output, shape index: {}]  }
   0x1   :  { %11 = vsyncpa [#allocation6], 0  ;;  %s18_s20 = sshll.u32 %s2408_s0, 4  ;;  %s19_s20 = int_to_ptr.vmem [resolvable:$true] %s18_s20 }
   0x2   :  { %s2102_s21 = scalar_lea.vmem %s19_s20, 16  ;;  %p2107_p1 = scmp.lt.s32.totalorder %s19_s20, %s19_s20 }
   0x3   :  { %p2103_p0 = scmp.ne.s32.totalorder %s19_s20, %s2102_s21  ;;  %p2108_p2 = scmp.lt.s32.totalorder %s2102_s21, %s2102_s21 }
   0x5   :  { %p2109_p3 = por %p2108_p2, %p2107_p1 }
   0x7   :  { %p2110_p4 = pnand %p2109_p3, %p2103_p0 }
   0x9   :  { %2113 = shalt.err (!%p2110_p4)
}
   0xa   :  { %s2172_s22 = smov [#allocation5]  }
   0xb   :  { %21 = dma.vmem_to_smem %s19_s20, 16, %s2172_s22, [#allocation7]  }
   0xc   :  { %2136 = dma.done.wait [#allocation7], 16  }
   0xd   :  { %2137 = vsyncadd [#allocation7], 4294967280 }
   0xe   :  { %31 = sfence }
   0xf   :  { %s33_s23 = sld [smem:[#allocation5]] }
  0x15   :  { %s34_s26 = scalar_lea.vmem %s2409_s1, %s33_s23 }
  0x16   :  { %v52_v0 = vld [vmem:[%s34_s26] sm:$0x1] }
  0x17   :  { %53 = vst [vmem:[#allocation2] sm:$0x1] %v52_v0 }
  0x18   :  { %78 = vsyncadd [#allocation4], 16  ;;  %s1871_s0 = sld [smem:[#allocation5 + $0x1]] }
  0x1e   :  { %s80_s29 = scalar_lea.vmem %s2409_s1, %s1871_s0 }
  0x1f   :  { %v100_v1 = vld [vmem:[%s80_s29] sm:$0x1] }
  0x20   :  { %101 = vst [vmem:[#allocation2 + $0x1] sm:$0x1] %v100_v1 }
  0x21   :  { %126 = vsyncadd [#allocation4 + $0x1], 16  ;;  %s1872_s30 = sld [smem:[#allocation5 + $0x2]] }
  0x27   :  { %s128_s8 = scalar_lea.vmem %s2409_s1, %s1872_s30 }
  0x28   :  { %v148_v2 = vld [vmem:[%s128_s8] sm:$0x1] }
  0x29   :  { %149 = vst [vmem:[#allocation2 + $0x8] sm:$0x1] %v148_v2 }
  0x2a   :  { %174 = vsyncadd [#allocation4 + $0x2], 16  ;;  %s1873_s9 = sld [smem:[#allocation5 + $0x3]] }
  0x30   :  { %s176_s12 = scalar_lea.vmem %s2409_s1, %s1873_s9 }
  0x31   :  { %v196_v3 = vld [vmem:[%s176_s12] sm:$0x1] }
  0x32   :  { %197 = vst [vmem:[#allocation2 + $0x9] sm:$0x1] %v196_v3 }
  0x33   :  { %222 = vsyncadd [#allocation4 + $0x3], 16  ;;  %s1874_s13 = sld [smem:[#allocation5 + $0x4]] }
  0x39   :  { %s224_s16 = scalar_lea.vmem %s2409_s1, %s1874_s13 }
  0x3a   :  { %v244_v4 = vld [vmem:[%s224_s16] sm:$0x1] }
  0x3b   :  { %245 = vst [vmem:[#allocation2 + $0x10] sm:$0x1] %v244_v4 }
  0x3c   :  { %270 = vsyncadd [#allocation4 + $0x4], 16  ;;  %s1875_s17 = sld [smem:[#allocation5 + $0x5]] }
  0x42   :  { %s272_s20 = scalar_lea.vmem %s2409_s1, %s1875_s17 }
  0x43   :  { %v292_v5 = vld [vmem:[%s272_s20] sm:$0x1] }
  0x44   :  { %293 = vst [vmem:[#allocation2 + $0x11] sm:$0x1] %v292_v5 }
  0x45   :  { %318 = vsyncadd [#allocation4 + $0x5], 16  ;;  %s1876_s21 = sld [smem:[#allocation5 + $0x6]] }
  0x4b   :  { %s320_s24 = scalar_lea.vmem %s2409_s1, %s1876_s21 }
  0x4c   :  { %v340_v6 = vld [vmem:[%s320_s24] sm:$0x1] }
  0x4d   :  { %341 = vst [vmem:[#allocation2 + $0x18] sm:$0x1] %v340_v6 }
  0x4e   :  { %366 = vsyncadd [#allocation4 + $0x6], 16  ;;  %s1877_s25 = sld [smem:[#allocation5 + $0x7]] }
  0x54   :  { %s368_s27 = scalar_lea.vmem %s2409_s1, %s1877_s25 }
  0x55   :  { %v388_v7 = vld [vmem:[%s368_s27] sm:$0x1] }
  0x56   :  { %389 = vst [vmem:[#allocation2 + $0x19] sm:$0x1] %v388_v7 }
  0x57   :  { %414 = vsyncadd [#allocation4 + $0x7], 16  ;;  %s1878_s28 = sld [smem:[#allocation5 + $0x8]] }
  0x5d   :  { %s416_s6 = scalar_lea.vmem %s2409_s1, %s1878_s28 }
  0x5e   :  { %v436_v8 = vld [vmem:[%s416_s6] sm:$0x1] }
  0x5f   :  { %437 = vst [vmem:[#allocation2 + $0x20] sm:$0x1] %v436_v8 }
  0x60   :  { %462 = vsyncadd [#allocation4 + $0x8], 16  ;;  %s1879_s7 = sld [smem:[#allocation5 + $0x9]] }
  0x66   :  { %s464_s10 = scalar_lea.vmem %s2409_s1, %s1879_s7 }
  0x67   :  { %v484_v9 = vld [vmem:[%s464_s10] sm:$0x1] }
  0x68   :  { %485 = vst [vmem:[#allocation2 + $0x21] sm:$0x1] %v484_v9 }
  0x69   :  { %510 = vsyncadd [#allocation4 + $0x9], 16  ;;  %s1880_s11 = sld [smem:[#allocation5 + $0xa]] }
  0x6f   :  { %s512_s14 = scalar_lea.vmem %s2409_s1, %s1880_s11 }
  0x70   :  { %v532_v10 = vld [vmem:[%s512_s14] sm:$0x1] }
  0x71   :  { %533 = vst [vmem:[#allocation2 + $0x28] sm:$0x1] %v532_v10 }
  0x72   :  { %558 = vsyncadd [#allocation4 + $0xa], 16  ;;  %s1881_s15 = sld [smem:[#allocation5 + $0xb]] }
  0x78   :  { %s560_s18 = scalar_lea.vmem %s2409_s1, %s1881_s15 }
  0x79   :  { %v580_v11 = vld [vmem:[%s560_s18] sm:$0x1] }
  0x7a   :  { %581 = vst [vmem:[#allocation2 + $0x29] sm:$0x1] %v580_v11 }
  0x7b   :  { %606 = vsyncadd [#allocation4 + $0xb], 16  ;;  %s1882_s19 = sld [smem:[#allocation5 + $0xc]] }
  0x81   :  { %s608_s22 = scalar_lea.vmem %s2409_s1, %s1882_s19 }
  0x82   :  { %v628_v12 = vld [vmem:[%s608_s22] sm:$0x1] }
  0x83   :  { %629 = vst [vmem:[#allocation2 + $0x30] sm:$0x1] %v628_v12 }
  0x84   :  { %654 = vsyncadd [#allocation4 + $0xc], 16  ;;  %s1883_s23 = sld [smem:[#allocation5 + $0xd]] }
  0x8a   :  { %s656_s26 = scalar_lea.vmem %s2409_s1, %s1883_s23 }
  0x8b   :  { %v676_v13 = vld [vmem:[%s656_s26] sm:$0x1] }
  0x8c   :  { %677 = vst [vmem:[#allocation2 + $0x31] sm:$0x1] %v676_v13 }
  0x8d   :  { %702 = vsyncadd [#allocation4 + $0xd], 16  ;;  %s1884_s0 = sld [smem:[#allocation5 + $0xe]] }
  0x93   :  { %s704_s29 = scalar_lea.vmem %s2409_s1, %s1884_s0 }
  0x94   :  { %v724_v14 = vld [vmem:[%s704_s29] sm:$0x1] }
  0x95   :  { %725 = vst [vmem:[#allocation2 + $0x38] sm:$0x1] %v724_v14 }
  0x96   :  { %750 = vsyncadd [#allocation4 + $0xe], 16  ;;  %s1885_s30 = sld [smem:[#allocation5 + $0xf]] }
  0x9c   :  { %s752_s8 = scalar_lea.vmem %s2409_s1, %s1885_s30 }
  0x9d   :  { %v772_v15 = vld [vmem:[%s752_s8] sm:$0x1] }
  0x9e   :  { %773 = vst [vmem:[#allocation2 + $0x39] sm:$0x1] %v772_v15 }
  0x9f   :  { %798 = vsyncadd [#allocation4 + $0xf], 16 }
  0xa0   :  { %2138 = dma.done.wait [#allocation4], 16 }
  0xa1   :  { %2139 = vsyncadd [#allocation4], 4294967280 }
  0xa2   :  { %2140 = dma.done.wait [#allocation4 + $0x1], 16 }
  0xa3   :  { %2141 = vsyncadd [#allocation4 + $0x1], 4294967280 }
  0xa4   :  { %2142 = dma.done.wait [#allocation4 + $0x2], 16 }
  0xa5   :  { %2143 = vsyncadd [#allocation4 + $0x2], 4294967280 }
  0xa6   :  { %2144 = dma.done.wait [#allocation4 + $0x3], 16 }
  0xa7   :  { %2145 = vsyncadd [#allocation4 + $0x3], 4294967280 }
  0xa8   :  { %2146 = dma.done.wait [#allocation4 + $0x4], 16 }
  0xa9   :  { %2147 = vsyncadd [#allocation4 + $0x4], 4294967280 }
  0xaa   :  { %2148 = dma.done.wait [#allocation4 + $0x5], 16 }
  0xab   :  { %2149 = vsyncadd [#allocation4 + $0x5], 4294967280 }
  0xac   :  { %2150 = dma.done.wait [#allocation4 + $0x6], 16 }
  0xad   :  { %2151 = vsyncadd [#allocation4 + $0x6], 4294967280 }
  0xae   :  { %2152 = dma.done.wait [#allocation4 + $0x7], 16 }
  0xaf   :  { %2153 = vsyncadd [#allocation4 + $0x7], 4294967280 }
  0xb0   :  { %2154 = dma.done.wait [#allocation4 + $0x8], 16 }
  0xb1   :  { %2155 = vsyncadd [#allocation4 + $0x8], 4294967280 }
  0xb2   :  { %2156 = dma.done.wait [#allocation4 + $0x9], 16 }
  0xb3   :  { %2157 = vsyncadd [#allocation4 + $0x9], 4294967280 }
  0xb4   :  { %2158 = dma.done.wait [#allocation4 + $0xa], 16 }
  0xb5   :  { %2159 = vsyncadd [#allocation4 + $0xa], 4294967280 }
  0xb6   :  { %2160 = dma.done.wait [#allocation4 + $0xb], 16 }
  0xb7   :  { %2161 = vsyncadd [#allocation4 + $0xb], 4294967280 }
  0xb8   :  { %2162 = dma.done.wait [#allocation4 + $0xc], 16 }
  0xb9   :  { %2163 = vsyncadd [#allocation4 + $0xc], 4294967280 }
  0xba   :  { %2164 = dma.done.wait [#allocation4 + $0xd], 16 }
  0xbb   :  { %2165 = vsyncadd [#allocation4 + $0xd], 4294967280 }
  0xbc   :  { %2166 = dma.done.wait [#allocation4 + $0xe], 16 }
  0xbd   :  { %2167 = vsyncadd [#allocation4 + $0xe], 4294967280 }
  0xbe   :  { %2168 = dma.done.wait [#allocation4 + $0xf], 16 }
  0xbf   :  { %2169 = vsyncadd [#allocation4 + $0xf], 4294967280  ;;  %v2173_v16 = vmov 0.0   ;;  %vm2174_vm0 = vmmov 0   ;;  %v2035_v17 = vld [vmem:[%s2410_s2] sm:$0xff]   ;;  %v833_v20 = vld [vmem:[#allocation2 + $0x8] sm:$0xff] }
  0xc0   :  { %1964 = vmatprep.subr.bf16.mxu1 %v2173_v16  ;;  %1968 = vmatprep.mubr.msk.bf16.mxu1 %vm2174_vm0, %v2173_v16  ;;  %v2269_v18 = vld [vmem:[%s2411_s3] sm:$0xff]   ;;  %vm859_vm1 = vcmask 130048   ;;  %v834_v21 = vld [vmem:[#allocation2 + $0x10] sm:$0xff]  ;;  %v835_v23 = vld [vmem:[#allocation2 + $0x18] sm:$0xff]  ;;  %v2175_v26 = vmov 0   ;;  %s2176_s14 = smov 64  }
  0xc1   :  { %1954 = vmatprep.subr.bf16.mxu0 %v2035_v17  ;;  %v832_v19 = vld [vmem:[#allocation2] sm:$0xff]  ;;  %1965 = vmatpush3.bf16.msra.mxu1 %v2269_v18  ;;  %v841_v24 = vpack.c.bf16 %v835_v23, %v834_v21  ;;  %v2276_v25 = vld [vmem:[%s2411_s3 + $0x8] sm:$0xff]   ;;  %vm962_vm2 = vcmask 261120   ;;  %v838_v7 = vld [vmem:[#allocation2 + $0x30] sm:$0xff]  ;;  %s2178_s15 = smov [#allocation8]  }
  0xc2   :  { %1955 = vmatpush3.bf16.msra.mxu0 %v2035_v17  ;;  %v840_v22 = vpack.c.bf16 %v833_v20, %v832_v19  ;;  %1966 = vmatprep.subr.bf16.mxu1 %v2173_v16  ;;  %v2296_v27 = vld [vmem:[%s2412_s4] ss:$0 sm:$0xff]  ;;  %s2177_s4 = smov 32   ;;  %v837_v6 = vld [vmem:[#allocation2 + $0x28] sm:$0xff]  ;;  %v839_v9 = vld [vmem:[#allocation2 + $0x38] sm:$0xff]  ;;  %s1560_s16 = sshll.u32 %s2178_s15, 4  ;;  %s1561_s16 = int_to_ptr.vmem [resolvable:$true] %s1560_s16 }
  0xc3   :  { %1980 = vmatprep.subr.bf16.mxu0 %v2173_v16  ;;  %v836_v5 = vld [vmem:[#allocation2 + $0x20] sm:$0xff]  ;;  %v843_v10 = vpack.c.bf16 %v839_v9, %v838_v7  ;;  %s2114_s17 = scalar_lea.vmem %s1561_s16, 128  ;;  %p2119_p6 = scmp.lt.s32.totalorder %s1561_s16, %s1561_s16 }
  0xc4   :  { %1956 = vmatprep.mubr.msk.bf16.mxu0 %vm859_vm1, %v840_v22  ;;  %v842_v8 = vpack.c.bf16 %v837_v6, %v836_v5  ;;  %p2115_p5 = scmp.ne.s32.totalorder %s1561_s16, %s2114_s17  ;;  %p2120_p7 = scmp.lt.s32.totalorder %s2114_s17, %s2114_s17 }
  0xc5   :  { %1957 = vmatmul.mubr.msk.bf16.vlgmr.msra.gmra.mrb[0].mxu0 %vm859_vm1, %v841_v24  ;;  %1967 = vmatpush3.bf16.msra.mxu1 %v2276_v25 }
  0xc6   :  { %1981 = vmatpush3.bf16.msra.mxu0 %v2269_v18  ;;  %1972 = vmatprep.subr.bf16.mxu1 %v2173_v16  ;;  %p2121_p8 = por %p2120_p7, %p2119_p6 }
  0xc7   :  { %1982 = vmatprep.subr.bf16.mxu0 %v2173_v16  ;;  %1960 = vmatprep.mubr.msk.bf16.mxu0 %vm859_vm1, %v842_v8 }
  0xc8   :  { %1969 = vmatmul.mubr.bf16.vlgmr.msra.gmra.mrb[0].mxu1 %v2175_v26  ;;  %p2122_p9 = pnand %p2121_p8, %p2115_p5 }
  0xc9   :  { %1973 = vmatpush3.bf16.msra.mxu1 %v2269_v18  ;;  %1976 = vmatprep.mubr.msk.bf16.mxu1 %vm2174_vm0, %v2173_v16 }
  0xca   :  { %1974 = vmatprep.subr.bf16.mxu1 %v2173_v16  ;;  %1983 = vmatpush3.bf16.msra.mxu0 %v2276_v25 }
  0xcb   :  { %1996 = vmatprep.subr.bf16.mxu0 %v2173_v16 }
  0xcd   :  { %1975 = vmatpush3.bf16.msra.mxu1 %v2276_v25  ;;  %1961 = vmatmul.mubr.msk.bf16.gmra.mrb[4].mxu0 %vm859_vm1, %v843_v10 }
  0xce   :  { %1988 = vmatprep.subr.bf16.mxu1 %v2173_v16  ;;  %1984 = vmatprep.mubr.msk.bf16.mxu0 %vm2174_vm0, %v2173_v16 }
 0x198   :  { %v2298_v28 = vpop.f32.mrb[0].mxu0 }
 0x199   :  { %v906_v29 = vpop.f32.mrb[1].mxu0  ;;  %v915_v22 = vadd.f32 %v2298_v28, %v2296_v27 }
 0x19a   :  { %v907_v30 = vadd.f32 %v2296_v27, %v906_v29  ;;  %v2301_v31 = vpop.f32.mrb[2].mxu0 }
 0x19b   :  { %v909_v32 = vpop.f32.mrb[3].mxu0  ;;  %v1000_v33 = vpop.f32.mrb[0].mxu1 }
 0x19c   :  { %v1006_v34 = vadd.f32 %v1000_v33, %v907_v30  ;;  %v1970_v35 = vpop.f32.mrb[1].mxu1  ;;  %v910_v53 = vadd.f32 %v2296_v27, %v909_v32 }
 0x19d   :  { %v1003_v36 = vpop.f32.mrb[2].mxu1 }
 0x19e   :  { %2038 = vtanh.f32 %v1006_v34  ;;  %v1971_v37 = vpop.f32.mrb[3].mxu1  ;;  %v1894_v39 = vmul.f32 -1.442695, %v1006_v34 }
 0x1a0   :  { %2040 = vpow2.f32 %v1894_v39  ;;  %v2323_v15 = vpop.f32.mrb[4].mxu0 }
 0x1a1   :  { %v2325_v17 = vpop.f32.mrb[5].mxu0 }
 0x1a2   :  { %v2327_v19 = vpop.f32.mrb[6].mxu0 }
 0x1a3   :  { %v2329_v20 = vpop.f32.mrb[7].mxu0 }
 0x1a8   :  { %v2039_v38 = vpop.eup %2038 }
 0x1a9   :  { %1016 = vrot.lane.b32.xlu0 %v2039_v38, %s2176_s14 }
 0x1aa   :  { %v2041_v40 = vpop.eup %2040 }
 0x1ab   :  { %v1010_v41 = vadd.f32 1.0, %v2041_v40 }
 0x1ad   :  { %2042 = vrcp.f32 %v1010_v41 }
 0x1b7   :  { %v2043_v42 = vpop.eup %2042 }
 0x1b8   :  { %v1014_v45 = vmul.f32 0.0, %v2043_v42 }
 0x21b   :  { %v1017_v43 = vpop.permute.xlu0 %1016 }
 0x21c   :  { %v1019_v44 = vmul.f32 %v2043_v42, %v1017_v43 }
 0x21e   :  { %1021 = vrot.lane.b32.xlu0 %v1019_v44, %s2177_s4 }
 0x290   :  { %v1022_v46 = vpop.permute.xlu0 %1021 }
 0x291   :  { %v1024_v47 = vadd.f32 %v1022_v46, %v1014_v45  ;;  %v918_v46 = vadd.f32 %v2301_v31, %v2296_v27 }
 0x293   :  { %2044 = vtanh.f32 %v1024_v47 }
 0x29d   :  { %v2045_v48 = vpop.eup %2044 }
 0x29e   :  { %1027 = vrot.lane.b32.xlu1 %v2045_v48, %s2176_s14 }
 0x310   :  { %v1028_v49 = vpop.permute.xlu1 %1027 }
 0x311   :  { %v1030_v50 = vmul.f32 %v2043_v42, %v1028_v49 }
 0x313   :  { %v1033_v51 = vpack.c.bf16 %v1030_v50, %v1030_v50 }
 0x315   :  { %1035 = vrot.lane.b32.xlu1 %v1033_v51, %s2177_s4 }
 0x387   :  { %v1036_v52 = vpop.permute.xlu1 %1035 }
 0x388   :  { %1977 = vmatmul.mubr.msk.bf16.vlgmr.msra.gmra.mrb[4].mxu1 %vm962_vm2, %v1036_v52 }
 0x389   :  { %1989 = vmatpush3.bf16.msra.mxu1 %v2269_v18  ;;  %1992 = vmatprep.mubr.msk.bf16.mxu1 %vm2174_vm0, %v2173_v16 }
 0x38a   :  { %1990 = vmatprep.subr.bf16.mxu1 %v2173_v16 }
 0x38d   :  { %1991 = vmatpush3.bf16.msra.mxu1 %v2276_v25 }
 0x38e   :  { %2004 = vmatprep.subr.bf16.mxu1 %v2173_v16 }
 0x45b   :  { %v1074_v54 = vpop.f32.mrb[4].mxu1 }
 0x45c   :  { %v1080_v55 = vadd.f32 %v1074_v54, %v910_v53  ;;  %v1978_v56 = vpop.f32.mrb[5].mxu1 }
 0x45d   :  { %v1077_v57 = vpop.f32.mrb[6].mxu1 }
 0x45e   :  { %2046 = vtanh.f32 %v1080_v55  ;;  %v1979_v58 = vpop.f32.mrb[7].mxu1  ;;  %v1896_v60 = vmul.f32 -1.442695, %v1080_v55 }
 0x460   :  { %2048 = vpow2.f32 %v1896_v60 }
 0x468   :  { %v2047_v59 = vpop.eup %2046 }
 0x469   :  { %1090 = vrot.lane.b32.xlu0 %v2047_v59, %s2176_s14 }
 0x46a   :  { %v2049_v61 = vpop.eup %2048 }
 0x46b   :  { %v1084_v62 = vadd.f32 1.0, %v2049_v61 }
 0x46d   :  { %2050 = vrcp.f32 %v1084_v62 }
 0x477   :  { %v2051_v63 = vpop.eup %2050 }
 0x478   :  { %v1088_v2 = vmul.f32 %v2051_v63, %v1024_v47 }
 0x4db   :  { %v1091_v0 = vpop.permute.xlu0 %1090 }
 0x4dc   :  { %v1093_v1 = vmul.f32 %v2051_v63, %v1091_v0 }
 0x4de   :  { %1095 = vrot.lane.b32.xlu1 %v1093_v1, %s2177_s4 }
 0x550   :  { %v1096_v3 = vpop.permute.xlu1 %1095 }
 0x551   :  { %v1098_v4 = vadd.f32 %v1096_v3, %v1088_v2  ;;  %v923_v2 = vadd.f32 %v2296_v27, %v2325_v17 }
 0x553   :  { %2052 = vtanh.f32 %v1098_v4 }
 0x55d   :  { %v2053_v11 = vpop.eup %2052 }
 0x55e   :  { %1101 = vrot.lane.b32.xlu0 %v2053_v11, %s2176_s14 }
 0x5d0   :  { %v1102_v12 = vpop.permute.xlu0 %1101 }
 0x5d1   :  { %v1104_v13 = vmul.f32 %v2051_v63, %v1102_v12 }
 0x5d3   :  { %v1107_v14 = vpack.c.bf16 %v1104_v13, %v1104_v13 }
 0x5d5   :  { %1109 = vrot.lane.b32.xlu1 %v1107_v14, %s2177_s4 }
 0x647   :  { %v1110_v21 = vpop.permute.xlu1 %1109 }
 0x648   :  { %1985 = vmatmul.mubr.msk.bf16.vlgmr.msra.gmra.mrb[8].mxu0 %vm962_vm2, %v1110_v21 }
 0x649   :  { %1997 = vmatpush3.bf16.msra.mxu0 %v2269_v18  ;;  %2000 = vmatprep.mubr.msk.bf16.mxu0 %vm2174_vm0, %v2173_v16 }
 0x64a   :  { %1998 = vmatprep.subr.bf16.mxu0 %v2173_v16 }
 0x64d   :  { %1999 = vmatpush3.bf16.msra.mxu0 %v2276_v25 }
 0x64e   :  { %2012 = vmatprep.subr.bf16.mxu0 %v2173_v16 }
 0x71b   :  { %v1148_v23 = vpop.f32.mrb[8].mxu0 }
 0x71c   :  { %v1154_v24 = vadd.f32 %v1148_v23, %v915_v22  ;;  %v1986_v26 = vpop.f32.mrb[9].mxu0 }
 0x71d   :  { %v1151_v29 = vpop.f32.mrb[10].mxu0 }
 0x71e   :  { %2054 = vtanh.f32 %v1154_v24  ;;  %v1987_v30 = vpop.f32.mrb[11].mxu0  ;;  %v1898_v33 = vmul.f32 -1.442695, %v1154_v24 }
 0x720   :  { %2056 = vpow2.f32 %v1898_v33 }
 0x728   :  { %v2055_v32 = vpop.eup %2054 }
 0x729   :  { %1164 = vrot.lane.b32.xlu0 %v2055_v32, %s2176_s14  ;;  %v926_v32 = vadd.f32 %v2296_v27, %v2329_v20 }
 0x72a   :  { %v2057_v34 = vpop.eup %2056 }
 0x72b   :  { %v1158_v35 = vadd.f32 1.0, %v2057_v34 }
 0x72d   :  { %2058 = vrcp.f32 %v1158_v35 }
 0x737   :  { %v2059_v36 = vpop.eup %2058 }
 0x738   :  { %v1162_v28 = vmul.f32 %v2059_v36, %v1098_v4 }
 0x79b   :  { %v1165_v37 = vpop.permute.xlu0 %1164 }
 0x79c   :  { %v1167_v38 = vmul.f32 %v2059_v36, %v1165_v37 }
 0x79e   :  { %1169 = vrot.lane.b32.xlu1 %v1167_v38, %s2177_s4 }
 0x810   :  { %v1170_v39 = vpop.permute.xlu1 %1169 }
 0x811   :  { %v1172_v40 = vadd.f32 %v1170_v39, %v1162_v28 }
 0x813   :  { %2060 = vtanh.f32 %v1172_v40 }
 0x81d   :  { %v2061_v41 = vpop.eup %2060 }
 0x81e   :  { %1175 = vrot.lane.b32.xlu0 %v2061_v41, %s2176_s14 }
 0x890   :  { %v1176_v42 = vpop.permute.xlu0 %1175 }
 0x891   :  { %v1178_v43 = vmul.f32 %v2059_v36, %v1176_v42 }
 0x893   :  { %v1181_v44 = vpack.c.bf16 %v1178_v43, %v1178_v43 }
 0x895   :  { %1183 = vrot.lane.b32.xlu1 %v1181_v44, %s2177_s4 }
 0x907   :  { %v1184_v45 = vpop.permute.xlu1 %1183 }
 0x908   :  { %1993 = vmatmul.mubr.msk.bf16.vlgmr.msra.gmra.mrb[8].mxu1 %vm962_vm2, %v1184_v45 }
 0x909   :  { %2005 = vmatpush3.bf16.msra.mxu1 %v2269_v18  ;;  %2008 = vmatprep.mubr.msk.bf16.mxu1 %vm2174_vm0, %v2173_v16 }
 0x90a   :  { %2006 = vmatprep.subr.bf16.mxu1 %v2173_v16 }
 0x90d   :  { %2007 = vmatpush3.bf16.msra.mxu1 %v2276_v25 }
 0x90e   :  { %2020 = vmatprep.subr.bf16.mxu1 %v2173_v16 }
 0x9db   :  { %v1222_v47 = vpop.f32.mrb[8].mxu1 }
 0x9dc   :  { %v1228_v48 = vadd.f32 %v1222_v47, %v918_v46  ;;  %v1994_v49 = vpop.f32.mrb[9].mxu1 }
 0x9dd   :  { %v1225_v50 = vpop.f32.mrb[10].mxu1 }
 0x9de   :  { %2062 = vtanh.f32 %v1228_v48  ;;  %v1995_v51 = vpop.f32.mrb[11].mxu1  ;;  %v1900_v53 = vmul.f32 -1.442695, %v1228_v48  ;;  %v931_v48 = vadd.f32 %v2323_v15, %v2296_v27 }
 0x9e0   :  { %2064 = vpow2.f32 %v1900_v53 }
 0x9e8   :  { %v2063_v52 = vpop.eup %2062 }
 0x9e9   :  { %1238 = vrot.lane.b32.xlu0 %v2063_v52, %s2176_s14 }
 0x9ea   :  { %v2065_v54 = vpop.eup %2064 }
 0x9eb   :  { %v1232_v55 = vadd.f32 1.0, %v2065_v54 }
 0x9ed   :  { %2066 = vrcp.f32 %v1232_v55 }
 0x9f7   :  { %v2067_v56 = vpop.eup %2066 }
 0x9f8   :  { %v1236_v31 = vmul.f32 %v2067_v56, %v1172_v40 }
 0xa5b   :  { %v1239_v57 = vpop.permute.xlu0 %1238 }
 0xa5c   :  { %v1241_v58 = vmul.f32 %v2067_v56, %v1239_v57 }
 0xa5e   :  { %1243 = vrot.lane.b32.xlu1 %v1241_v58, %s2177_s4 }
 0xad0   :  { %v1244_v59 = vpop.permute.xlu1 %1243 }
 0xad1   :  { %v1246_v60 = vadd.f32 %v1244_v59, %v1236_v31 }
 0xad3   :  { %2068 = vtanh.f32 %v1246_v60 }
 0xadd   :  { %v2069_v61 = vpop.eup %2068 }
 0xade   :  { %1249 = vrot.lane.b32.xlu0 %v2069_v61, %s2176_s14 }
 0xb50   :  { %v1250_v62 = vpop.permute.xlu0 %1249 }
 0xb51   :  { %v1252_v63 = vmul.f32 %v2067_v56, %v1250_v62 }
 0xb53   :  { %v1255_v0 = vpack.c.bf16 %v1252_v63, %v1252_v63 }
 0xb55   :  { %1257 = vrot.lane.b32.xlu1 %v1255_v0, %s2177_s4 }
 0xbc7   :  { %v1258_v1 = vpop.permute.xlu1 %1257 }
 0xbc8   :  { %2001 = vmatmul.mubr.msk.bf16.vlgmr.msra.gmra.mrb[12].mxu0 %vm962_vm2, %v1258_v1 }
 0xbc9   :  { %2013 = vmatpush3.bf16.msra.mxu0 %v2269_v18  ;;  %2016 = vmatprep.mubr.msk.bf16.mxu0 %vm2174_vm0, %v2173_v16 }
 0xbca   :  { %2014 = vmatprep.subr.bf16.mxu0 %v2173_v16 }
 0xbcd   :  { %2015 = vmatpush3.bf16.msra.mxu0 %v2276_v25 }
 0xc9b   :  { %v1296_v3 = vpop.f32.mrb[12].mxu0 }
 0xc9c   :  { %v1302_v4 = vadd.f32 %v1296_v3, %v923_v2  ;;  %v2002_v5 = vpop.f32.mrb[13].mxu0  ;;  %v934_v3 = vadd.f32 %v2327_v19, %v2296_v27 }
 0xc9d   :  { %v1299_v6 = vpop.f32.mrb[14].mxu0 }
 0xc9e   :  { %2070 = vtanh.f32 %v1302_v4  ;;  %v2003_v7 = vpop.f32.mrb[15].mxu0  ;;  %v1902_v9 = vmul.f32 -1.442695, %v1302_v4 }
 0xca0   :  { %2072 = vpow2.f32 %v1902_v9 }
 0xca8   :  { %v2071_v8 = vpop.eup %2070 }
 0xca9   :  { %1312 = vrot.lane.b32.xlu0 %v2071_v8, %s2176_s14 }
 0xcaa   :  { %v2073_v10 = vpop.eup %2072 }
 0xcab   :  { %v1306_v11 = vadd.f32 1.0, %v2073_v10 }
 0xcad   :  { %2074 = vrcp.f32 %v1306_v11 }
 0xcb7   :  { %v2075_v12 = vpop.eup %2074 }
 0xcb8   :  { %v1310_v17 = vmul.f32 %v2075_v12, %v1246_v60 }
 0xd1b   :  { %v1313_v13 = vpop.permute.xlu0 %1312 }
 0xd1c   :  { %v1315_v14 = vmul.f32 %v2075_v12, %v1313_v13 }
 0xd1e   :  { %1317 = vrot.lane.b32.xlu1 %v1315_v14, %s2177_s4 }
 0xd90   :  { %v1318_v21 = vpop.permute.xlu1 %1317 }
 0xd91   :  { %v1320_v22 = vadd.f32 %v1318_v21, %v1310_v17 }
 0xd93   :  { %2076 = vtanh.f32 %v1320_v22 }
 0xd9d   :  { %v2077_v23 = vpop.eup %2076 }
 0xd9e   :  { %1323 = vrot.lane.b32.xlu0 %v2077_v23, %s2176_s14 }
 0xe10   :  { %v1324_v24 = vpop.permute.xlu0 %1323 }
 0xe11   :  { %v1326_v26 = vmul.f32 %v2075_v12, %v1324_v24 }
 0xe13   :  { %v1329_v29 = vpack.c.bf16 %v1326_v26, %v1326_v26 }
 0xe15   :  { %1331 = vrot.lane.b32.xlu1 %v1329_v29, %s2177_s4 }
 0xe87   :  { %v1332_v30 = vpop.permute.xlu1 %1331 }
 0xe88   :  { %2009 = vmatmul.mubr.msk.bf16.vlgmr.msra.gmra.mrb[12].mxu1 %vm962_vm2, %v1332_v30 }
 0xe89   :  { %2021 = vmatpush3.bf16.msra.mxu1 %v2269_v18  ;;  %2024 = vmatprep.mubr.msk.bf16.mxu1 %vm2174_vm0, %v2173_v16 }
 0xe8a   :  { %2022 = vmatprep.subr.bf16.mxu1 %v2173_v16 }
 0xe8d   :  { %2023 = vmatpush3.bf16.msra.mxu1 %v2276_v25 }
 0xf5b   :  { %v1370_v33 = vpop.f32.mrb[12].mxu1 }
 0xf5c   :  { %v1376_v34 = vadd.f32 %v1370_v33, %v926_v32  ;;  %v2010_v35 = vpop.f32.mrb[13].mxu1 }
 0xf5d   :  { %v1373_v36 = vpop.f32.mrb[14].mxu1 }
 0xf5e   :  { %2078 = vtanh.f32 %v1376_v34  ;;  %v2011_v37 = vpop.f32.mrb[15].mxu1  ;;  %v1904_v18 = vmul.f32 -1.442695, %v1376_v34 }
 0xf60   :  { %2080 = vpow2.f32 %v1904_v18 }
 0xf68   :  { %v2079_v38 = vpop.eup %2078 }
 0xf69   :  { %1386 = vrot.lane.b32.xlu0 %v2079_v38, %s2176_s14 }
 0xf6a   :  { %v2081_v28 = vpop.eup %2080 }
 0xf6b   :  { %v1380_v39 = vadd.f32 1.0, %v2081_v28 }
 0xf6d   :  { %2082 = vrcp.f32 %v1380_v39 }
 0xf77   :  { %v2083_v16 = vpop.eup %2082 }
 0xf78   :  { %v1384_v20 = vmul.f32 %v2083_v16, %v1320_v22 }
 0xfdb   :  { %v1387_v40 = vpop.permute.xlu0 %1386 }
 0xfdc   :  { %v1389_v25 = vmul.f32 %v2083_v16, %v1387_v40 }
 0xfde   :  { %1391 = vrot.lane.b32.xlu1 %v1389_v25, %s2177_s4 }
0x1050   :  { %v1392_v41 = vpop.permute.xlu1 %1391 }
0x1051   :  { %v1394_v42 = vadd.f32 %v1392_v41, %v1384_v20 }
0x1053   :  { %2084 = vtanh.f32 %v1394_v42 }
0x105d   :  { %v2085_v43 = vpop.eup %2084 }
0x105e   :  { %1397 = vrot.lane.b32.xlu0 %v2085_v43, %s2176_s14 }
0x10d0   :  { %v1398_v44 = vpop.permute.xlu0 %1397 }
0x10d1   :  { %v1400_v45 = vmul.f32 %v2083_v16, %v1398_v44 }
0x10d3   :  { %v1403_v46 = vpack.c.bf16 %v1400_v45, %v1400_v45 }
0x10d5   :  { %1405 = vrot.lane.b32.xlu1 %v1403_v46, %s2177_s4 }
0x1147   :  { %v1406_v47 = vpop.permute.xlu1 %1405 }
0x1148   :  { %2017 = vmatmul.mubr.msk.bf16.vlgmr.msra.gmra.mrb[16].mxu0 %vm962_vm2, %v1406_v47 }
0x121b   :  { %v1444_v49 = vpop.f32.mrb[16].mxu0 }
0x121c   :  { %v1450_v50 = vadd.f32 %v1444_v49, %v931_v48  ;;  %v2018_v51 = vpop.f32.mrb[17].mxu0 }
0x121d   :  { %v1447_v52 = vpop.f32.mrb[18].mxu0 }
0x121e   :  { %2086 = vtanh.f32 %v1450_v50  ;;  %v2019_v53 = vpop.f32.mrb[19].mxu0  ;;  %v1906_v55 = vmul.f32 -1.442695, %v1450_v50 }
0x1220   :  { %2088 = vpow2.f32 %v1906_v55 }
0x1228   :  { %v2087_v54 = vpop.eup %2086 }
0x1229   :  { %1460 = vrot.lane.b32.xlu0 %v2087_v54, %s2176_s14 }
0x122a   :  { %v2089_v56 = vpop.eup %2088 }
0x122b   :  { %v1454_v57 = vadd.f32 1.0, %v2089_v56 }
0x122d   :  { %2090 = vrcp.f32 %v1454_v57 }
0x1237   :  { %v2091_v58 = vpop.eup %2090 }
0x1238   :  { %v1458_v15 = vmul.f32 %v2091_v58, %v1394_v42 }
0x129b   :  { %v1461_v31 = vpop.permute.xlu0 %1460 }
0x129c   :  { %v1463_v59 = vmul.f32 %v2091_v58, %v1461_v31 }
0x129e   :  { %1465 = vrot.lane.b32.xlu1 %v1463_v59, %s2177_s4 }
0x1310   :  { %v1466_v60 = vpop.permute.xlu1 %1465 }
0x1311   :  { %v1468_v61 = vadd.f32 %v1466_v60, %v1458_v15 }
0x1313   :  { %2092 = vtanh.f32 %v1468_v61 }
0x131d   :  { %v2093_v62 = vpop.eup %2092 }
0x131e   :  { %1471 = vrot.lane.b32.xlu0 %v2093_v62, %s2176_s14 }
0x1390   :  { %v1472_v63 = vpop.permute.xlu0 %1471 }
0x1391   :  { %v1474_v0 = vmul.f32 %v2091_v58, %v1472_v63 }
0x1393   :  { %v1477_v1 = vpack.c.bf16 %v1474_v0, %v1474_v0 }
0x1395   :  { %1479 = vrot.lane.b32.xlu1 %v1477_v1, %s2177_s4 }
0x1407   :  { %v1480_v2 = vpop.permute.xlu1 %1479 }
0x1408   :  { %2025 = vmatmul.mubr.msk.bf16.vlgmr.msra.gmra.mrb[16].mxu1 %vm962_vm2, %v1480_v2 }
0x14db   :  { %v1518_v4 = vpop.f32.mrb[16].mxu1 }
0x14dc   :  { %v1524_v5 = vadd.f32 %v1518_v4, %v934_v3  ;;  %v2026_v6 = vpop.f32.mrb[17].mxu1 }
0x14dd   :  { %v1521_v7 = vpop.f32.mrb[18].mxu1 }
0x14de   :  { %2094 = vtanh.f32 %v1524_v5  ;;  %v2027_v8 = vpop.f32.mrb[19].mxu1  ;;  %v1908_v10 = vmul.f32 -1.442695, %v1524_v5 }
0x14e0   :  { %2096 = vpow2.f32 %v1908_v10 }
0x14e8   :  { %v2095_v9 = vpop.eup %2094 }
0x14e9   :  { %1534 = vrot.lane.b32.xlu0 %v2095_v9, %s2176_s14 }
0x14ea   :  { %v2097_v11 = vpop.eup %2096 }
0x14eb   :  { %v1528_v12 = vadd.f32 1.0, %v2097_v11 }
0x14ed   :  { %2098 = vrcp.f32 %v1528_v12 }
0x14f7   :  { %v2099_v13 = vpop.eup %2098 }
0x14f8   :  { %v1532_v27 = vmul.f32 %v2099_v13, %v1468_v61 }
0x155b   :  { %v1535_v14 = vpop.permute.xlu0 %1534 }
0x155c   :  { %v1537_v17 = vmul.f32 %v2099_v13, %v1535_v14 }
0x155e   :  { %1539 = vrot.lane.b32.xlu1 %v1537_v17, %s2177_s4 }
0x15d0   :  { %v1540_v19 = vpop.permute.xlu1 %1539 }
0x15d1   :  { %v1542_v21 = vadd.f32 %v1540_v19, %v1532_v27 }
0x15d3   :  { %2100 = vtanh.f32 %v1542_v21 }
0x15dd   :  { %v2101_v22 = vpop.eup %2100 }
0x15de   :  { %1545 = vrot.lane.b32.xlu0 %v2101_v22, %s2176_s14 }
0x1650   :  { %v1546_v23 = vpop.permute.xlu0 %1545 }
0x1651   :  { %v1548_v24 = vmul.f32 %v2099_v13, %v1546_v23 }
0x1653   :  { %1550 = vrot.lane.b32.xlu1 %v1548_v24, %s2177_s4 }
0x16c5   :  { %v1551_v26 = vpop.permute.xlu1 %1550 }
0x16c6   :  { %1553 = vst.msk [vmem:[#allocation8] sm:$0xff] %vm962_vm2, %v1551_v26 }
0x16c7   :  { %2125 = shalt.err (!%p2122_p9)
}
0x16c8   :  { %s2126_s20 = scalar_lea.hbm %s2413_s5, 128 }
0x16c9   :  { %p2127_p10 = scmp.ne.s32.totalorder %s2413_s5, %s2126_s20  ;;  %p2130_p11 = scmp.lt.u32.totalorder %s2126_s20, %s2413_s5 }
0x16cb   :  { %p2132_p12 = pnand %p2130_p11, %p2127_p10 }
0x16cd   :  { %2135 = shalt.err (!%p2132_p12)
}
0x16ce   :  { %1563 = dma.vmem_to_hbm [thread:$0]  %s1561_s16, 128, %s2413_s5, [#allocation6]  }
0x16cf   :  { %2170 = dma.done.wait [#allocation6], 128  }
0x16d0   :  { %2171 = vsyncadd [#allocation6], 4294967168 }
0x16d1   :  { %1567 = vsyncpa [#allocation6], 1 }
0x16d2   :  { %1568 = vsyncpa [#allocation7], 1 }
0x16d3   :  { %1569 = vsyncmov [#allocation4] }
0x16d6   :  { %s1570_s0 = vpop.sfrf %1569 }
0x16d7   :  { %p1909_p13 = scmp.ne.s32.totalorder %s1570_s0, 0 }
0x16d9   :  { %1574 = shalt.err (%p1909_p13)  }
0x16da   :  { %1576 = vsyncmov [#allocation4 + $0x1] }
0x16dd   :  { %s1577_s27 = vpop.sfrf %1576 }
0x16de   :  { %p1910_p0 = scmp.ne.s32.totalorder %s1577_s27, 0 }
0x16e0   :  { %1581 = shalt.err (%p1910_p0)  }
0x16e1   :  { %1583 = vsyncmov [#allocation4 + $0x2] }
0x16e4   :  { %s1584_s28 = vpop.sfrf %1583 }
0x16e5   :  { %p1911_p1 = scmp.ne.s32.totalorder %s1584_s28, 0 }
0x16e7   :  { %1588 = shalt.err (%p1911_p1)  }
0x16e8   :  { %1590 = vsyncmov [#allocation4 + $0x3] }
0x16eb   :  { %s1591_s29 = vpop.sfrf %1590 }
0x16ec   :  { %p1912_p2 = scmp.ne.s32.totalorder %s1591_s29, 0 }
0x16ee   :  { %1595 = shalt.err (%p1912_p2)  }
0x16ef   :  { %1597 = vsyncmov [#allocation4 + $0x4] }
0x16f2   :  { %s1598_s5 = vpop.sfrf %1597 }
0x16f3   :  { %p1913_p3 = scmp.ne.s32.totalorder %s1598_s5, 0 }
0x16f5   :  { %1602 = shalt.err (%p1913_p3)  }
0x16f6   :  { %1604 = vsyncmov [#allocation4 + $0x5] }
0x16f9   :  { %s1605_s30 = vpop.sfrf %1604 }
0x16fa   :  { %p1914_p4 = scmp.ne.s32.totalorder %s1605_s30, 0 }
0x16fc   :  { %1609 = shalt.err (%p1914_p4)  }
0x16fd   :  { %1611 = vsyncmov [#allocation4 + $0x6] }
0x1700   :  { %s1612_s6 = vpop.sfrf %1611 }
0x1701   :  { %p1915_p5 = scmp.ne.s32.totalorder %s1612_s6, 0 }
0x1703   :  { %1616 = shalt.err (%p1915_p5)  }
0x1704   :  { %1618 = vsyncmov [#allocation4 + $0x7] }
0x1707   :  { %s1619_s7 = vpop.sfrf %1618 }
0x1708   :  { %p1916_p6 = scmp.ne.s32.totalorder %s1619_s7, 0 }
0x170a   :  { %1623 = shalt.err (%p1916_p6)  }
0x170b   :  { %1625 = vsyncmov [#allocation4 + $0x8] }
0x170e   :  { %s1626_s8 = vpop.sfrf %1625 }
0x170f   :  { %p1917_p7 = scmp.ne.s32.totalorder %s1626_s8, 0 }
0x1711   :  { %1630 = shalt.err (%p1917_p7)  }
0x1712   :  { %1632 = vsyncmov [#allocation4 + $0x9] }
0x1715   :  { %s1633_s1 = vpop.sfrf %1632 }
0x1716   :  { %p1918_p8 = scmp.ne.s32.totalorder %s1633_s1, 0 }
0x1718   :  { %1637 = shalt.err (%p1918_p8)  }
0x1719   :  { %1639 = vsyncmov [#allocation4 + $0xa] }
0x171c   :  { %s1640_s9 = vpop.sfrf %1639 }
0x171d   :  { %p1919_p9 = scmp.ne.s32.totalorder %s1640_s9, 0 }
0x171f   :  { %1644 = shalt.err (%p1919_p9)  }
0x1720   :  { %1646 = vsyncmov [#allocation4 + $0xb] }
0x1723   :  { %s1647_s10 = vpop.sfrf %1646 }
0x1724   :  { %p1920_p10 = scmp.ne.s32.totalorder %s1647_s10, 0 }
0x1726   :  { %1651 = shalt.err (%p1920_p10)  }
0x1727   :  { %1653 = vsyncmov [#allocation4 + $0xc] }
0x172a   :  { %s1654_s11 = vpop.sfrf %1653 }
0x172b   :  { %p1921_p11 = scmp.ne.s32.totalorder %s1654_s11, 0 }
0x172d   :  { %1658 = shalt.err (%p1921_p11)  }
0x172e   :  { %1660 = vsyncmov [#allocation4 + $0xd] }
0x1731   :  { %s1661_s12 = vpop.sfrf %1660 }
0x1732   :  { %p1922_p12 = scmp.ne.s32.totalorder %s1661_s12, 0 }
0x1734   :  { %1665 = shalt.err (%p1922_p12)  }
0x1735   :  { %1667 = vsyncmov [#allocation4 + $0xe] }
0x1738   :  { %s1668_s2 = vpop.sfrf %1667 }
0x1739   :  { %p1923_p13 = scmp.ne.s32.totalorder %s1668_s2, 0 }
0x173b   :  { %1672 = shalt.err (%p1923_p13)  }
0x173c   :  { %1674 = vsyncmov [#allocation4 + $0xf] }
0x173f   :  { %s1675_s3 = vpop.sfrf %1674 }
0x1740   :  { %p1924_p0 = scmp.ne.s32.totalorder %s1675_s3, 0 }
0x1742   :  { %1679 = shalt.err (%p1924_p0)  }

</bundles_post_ra>
